<compile_context>
chip_gen: v6e
topology: v6e:2x2x1
jax: 0.10.0
libtpu: 0.0.40
codegen_flags: <defaults>
</compile_context>

<pallas_src>
import jax
import jax.numpy as jnp
from jax.experimental import pallas as pl
from jax.experimental.pallas import tpu as pltpu

K = 7                      # conv kernel size
C_IN = 3
C_OUT = 32
H_IN = 32                  # implied by Linear(32*13*13): 32 -> conv 26 -> pool 13
H_CONV = H_IN - K + 1      # 26
H_POOL = H_CONV // 2       # 13
P = H_POOL * H_POOL        # 169 pooled positions
P_PAD = 176                # 169 -> multiple of 16 (pad rows killed by zero w2 rows)
F = C_IN * K * K           # 147 patch features (c, kh, kw) order
F_PAD = 160                # 147 -> multiple of 16 (sublane axis of the patch tensor)
N_CLASSES = 10
N_PAD = 128                # 10 -> one full lane group (unmasked stores)
FLAT = C_OUT * P           # 5408
FLAT_PAD = C_OUT * P_PAD   # 5632 = 44 * 128


# ---------------------------------------------------------------------------
# Kernel A: conv (single matmul) + 2x2 max-pool + bias + ReLU, one image / step.
# ---------------------------------------------------------------------------
def conv_relu_pool_kernel(patches_ref, w1_ref, b1_ref, out_ref):
    # patches_ref: (1, F_PAD, 4*P_PAD) bf16   columns ordered (quadrant, position)
    # w1_ref:      (C_OUT, F_PAD)      bf16
    # b1_ref:      (C_OUT, 1)          f32
    # out_ref:     (1, C_OUT, P_PAD)   bf16   (c, h, w) order -> flatten is free
    conv = jnp.dot(w1_ref[...], patches_ref[0],
                   preferred_element_type=jnp.float32)          # (32, 704) f32

    # 2x2 max-pool == max over the 4 quadrant column groups (pure VPU work).
    m = conv[:, 0:P_PAD]
    for q in range(1, 4):
        m = jnp.maximum(m, conv[:, q * P_PAD:(q + 1) * P_PAD])

    # Bias + ReLU once, after the max (exact rewrite of ReLU-then-pool).
    act = jnp.maximum(m + b1_ref[...], 0.0)                     # (32, 176) f32
    out_ref[0] = act.astype(out_ref.dtype)


def conv_relu_pool(patches_t, w1t, b1_col):
    B = patches_t.shape[0]
    return pl.pallas_call(
        conv_relu_pool_kernel,
        out_shape=jax.ShapeDtypeStruct((B, C_OUT, P_PAD), jnp.bfloat16),
        grid=(B,),
        in_specs=[
            pl.BlockSpec((1, F_PAD, 4 * P_PAD), lambda b: (b, 0, 0)),
            pl.BlockSpec((C_OUT, F_PAD), lambda b: (0, 0)),
            pl.BlockSpec((C_OUT, 1), lambda b: (0, 0)),
        ],
        out_specs=pl.BlockSpec((1, C_OUT, P_PAD), lambda b: (b, 0, 0)),
        compiler_params=pltpu.CompilerParams(
            dimension_semantics=("parallel",)),
    )(patches_t, w1t, b1_col)


# ---------------------------------------------------------------------------
# Kernel B: linear layer, batch-tiled, 128-lane padded output.
# ---------------------------------------------------------------------------
def linear_kernel(x_ref, w_ref, b_ref, o_ref):
    o_ref[...] = (
        jnp.dot(x_ref[...], w_ref[...], preferred_element_type=jnp.float32)
        + b_ref[...]
    )


def linear(flat, w2_mat, b2_row):
    B, fin = flat.shape
    tb = B if B <= 256 else 256                  # batch tile (caps VMEM, enables 2-TC split)
    return pl.pallas_call(
        linear_kernel,
        out_shape=jax.ShapeDtypeStruct((B, N_PAD), jnp.float32),
        grid=(pl.cdiv(B, tb),),
        in_specs=[
            pl.BlockSpec((tb, fin), lambda i: (i, 0)),
            pl.BlockSpec((fin, N_PAD), lambda i: (0, 0)),
            pl.BlockSpec((1, N_PAD), lambda i: (0, 0)),
        ],
        out_specs=pl.BlockSpec((tb, N_PAD), lambda i: (i, 0)),
        compiler_params=pltpu.CompilerParams(
            dimension_semantics=("parallel",)),
    )(flat, w2_mat, b2_row)


# ---------------------------------------------------------------------------
# Glue: one-op im2col (transposed, quadrant-grouped), weight padding, forward.
# ---------------------------------------------------------------------------
def _im2col_qp(xb):
    """xb: (B,3,32,32) bf16 -> im2col^T grouped by pool quadrant: (B, F_PAD, 4*P_PAD).

    Row f = c*49 + kh*7 + kw (PyTorch Conv2d weight flatten order); column
    q*P_PAD + (h*13 + w) with q = dh*2+dw holds the patch whose conv output sits at
    spatial position (2h+dh, 2w+dw). Built with a single one-hot-filter conv."""
    B = xb.shape[0]
    eye = jnp.eye(F, dtype=xb.dtype).reshape(F, C_IN, K, K)     # delta(f, c*49+kh*7+kw)
    pat = jax.lax.conv_general_dilated(
        xb, eye, window_strides=(1, 1), padding="VALID",
        dimension_numbers=("NCHW", "OIHW", "NCHW"))             # (B, 147, 26, 26), exact
    pat = pat.reshape(B, F, H_POOL, 2, H_POOL, 2)               # (B, F, h, dh, w, dw)
    pat = pat.transpose(0, 1, 3, 5, 2, 4)                       # (B, F, dh, dw, h, w)
    pat = pat.reshape(B, F, 4, P)
    pat = jnp.pad(pat, ((0, 0), (0, F_PAD - F), (0, 0), (0, P_PAD - P)))
    return pat.reshape(B, F_PAD, 4 * P_PAD)                     # (B, 160, 704)


def vanilla_cnn_forward(x, w1, b1, w2, b2):
    """x: (B,3,32,32) NCHW. w1: (32,3,7,7), b1: (32,), w2: (10,5408), b2: (10,)."""
    B = x.shape[0]
    patches_t = _im2col_qp(x.astype(jnp.bfloat16))              # (B, 160, 704) bf16

    w1t = jnp.pad(w1.reshape(C_OUT, F),
                  ((0, 0), (0, F_PAD - F))).astype(jnp.bfloat16)   # (32, 160)
    b1_col = b1.reshape(C_OUT, 1).astype(jnp.float32)

    pooled = conv_relu_pool(patches_t, w1t, b1_col)             # (B, 32, 176) bf16
    flat = pooled.reshape(B, FLAT_PAD)                          # (c,h,w) order, free

    # w2 rows reordered to (c, p_padded); padded p rows and padded class columns are 0.
    w2_r = jnp.pad(w2.reshape(N_CLASSES, C_OUT, P),
                   ((0, N_PAD - N_CLASSES), (0, 0), (0, P_PAD - P)))   # (128, 32, 176)
    w2_mat = w2_r.transpose(1, 2, 0).reshape(FLAT_PAD, N_PAD).astype(jnp.bfloat16)
    b2_row = jnp.pad(b2, (0, N_PAD - N_CLASSES)).reshape(1, N_PAD).astype(jnp.float32)

    logits = linear(flat, w2_mat, b2_row)                       # (B, 128) f32
    return logits[:, :N_CLASSES]


def reference_forward(x, w1, b1, w2, b2):
    conv = jax.lax.conv_general_dilated(
        x, w1, window_strides=(1, 1), padding="VALID",
        dimension_numbers=("NCHW", "OIHW", "NCHW"))
    conv = jnp.maximum(conv + b1[None, :, None, None], 0.0)
    pooled = jax.lax.reduce_window(
        conv, -jnp.inf, jax.lax.max,
        window_dimensions=(1, 1, 2, 2), window_strides=(1, 1, 2, 2),
        padding="VALID")
    flat = pooled.reshape(x.shape[0], -1)                       # PyTorch (c, h, w) order
    return flat @ w2.T + b2


if __name__ == "__main__":
    key = jax.random.PRNGKey(0)
    k1, k2, k3, k4, k5 = jax.random.split(key, 5)

    w1 = jax.random.normal(k1, (C_OUT, C_IN, K, K), jnp.float32) * 0.05
    b1 = jax.random.normal(k2, (C_OUT,), jnp.float32) * 0.05
    w2 = jax.random.normal(k3, (N_CLASSES, FLAT), jnp.float32) * 0.02
    b2 = jax.random.normal(k4, (N_CLASSES,), jnp.float32) * 0.02

    x = jax.random.normal(k5, (2, C_IN, H_IN, H_IN), jnp.float32)  # (B,3,32,32) NCHW

    fwd = jax.jit(vanilla_cnn_forward)
    out = jax.block_until_ready(fwd(x, w1, b1, w2, b2))
    ref = jax.block_until_ready(reference_forward(x, w1, b1, w2, b2))

    assert out.shape == (2, N_CLASSES), out.shape
    # bf16 MXU inputs with f32 accumulation -> slightly looser tolerance than pure f32.
    assert jnp.allclose(out, ref, rtol=3e-2, atol=3e-2), (out, ref)
    print("KERNEL_OK")
</pallas_src>

<mosaic_0001>
module attributes {stable_mosaic.version = 11 : i64} {
  func.func @conv_relu_pool_kernel(%arg0: i32, %arg1: memref<1x160x704xbf16, #tpu.memory_space<vmem>>, %arg2: memref<32x160xbf16, #tpu.memory_space<vmem>>, %arg3: memref<32x1xf32, #tpu.memory_space<vmem>>, %arg4: memref<1x32x176xbf16, #tpu.memory_space<vmem>>) attributes {dimension_semantics = [#tpu.dimension_semantics<parallel>], iteration_bounds = array<i64: 2>, scalar_prefetch = 0 : i64, scratch_operands = 0 : i64, tpu.core_type = #tpu.core_type<tc>, window_params = [{transform_indices = @transform_0, window_bounds = array<i64: 1, 160, 704>}, {pipeline_mode = #tpu.pipeline_mode<synchronous>, transform_indices = @transform_1, window_bounds = array<i64: 32, 160>}, {pipeline_mode = #tpu.pipeline_mode<synchronous>, transform_indices = @transform_2, window_bounds = array<i64: 32, 1>}, {transform_indices = @transform_3, window_bounds = array<i64: 1, 32, 176>}]} {
    %c0 = arith.constant 0 : index
    %c0_0 = arith.constant 0 : index
    %0 = vector.load %arg2[%c0, %c0_0] : memref<32x160xbf16, #tpu.memory_space<vmem>>, vector<32x160xbf16>
    %c0_1 = arith.constant 0 : index
    %c0_2 = arith.constant 0 : index
    %c0_3 = arith.constant 0 : index
    %1 = vector.load %arg1[%c0_1, %c0_2, %c0_3] : memref<1x160x704xbf16, #tpu.memory_space<vmem>>, vector<1x160x704xbf16>
    %2 = vector.shape_cast %1 : vector<1x160x704xbf16> to vector<160x704xbf16>
    %cst = arith.constant dense<0.000000e+00> : vector<32x704xf32>
    %3 = tpu.matmul %0, %2, %cst {dimension_numbers = #tpu.dot_dimension_numbers<[1], [0], [0], [1], [0, 0, 1, 1], [], []>} : vector<32x160xbf16>, vector<160x704xbf16>, vector<32x704xf32> -> vector<32x704xf32>
    %4 = vector.extract_strided_slice %3 {offsets = [0, 0], sizes = [32, 176], strides = [1, 1]} : vector<32x704xf32> to vector<32x176xf32>
    %5 = vector.extract_strided_slice %3 {offsets = [0, 176], sizes = [32, 176], strides = [1, 1]} : vector<32x704xf32> to vector<32x176xf32>
    %6 = arith.maximumf %4, %5 : vector<32x176xf32>
    %7 = vector.extract_strided_slice %3 {offsets = [0, 352], sizes = [32, 176], strides = [1, 1]} : vector<32x704xf32> to vector<32x176xf32>
    %8 = arith.maximumf %6, %7 : vector<32x176xf32>
    %9 = vector.extract_strided_slice %3 {offsets = [0, 528], sizes = [32, 176], strides = [1, 1]} : vector<32x704xf32> to vector<32x176xf32>
    %10 = arith.maximumf %8, %9 : vector<32x176xf32>
    %c0_4 = arith.constant 0 : index
    %c0_5 = arith.constant 0 : index
    %11 = vector.load %arg3[%c0_4, %c0_5] : memref<32x1xf32, #tpu.memory_space<vmem>>, vector<32x1xf32>
    %12 = vector.broadcast %11 : vector<32x1xf32> to vector<32x176xf32>
    %13 = arith.addf %10, %12 : vector<32x176xf32>
    %cst_6 = arith.constant 0.000000e+00 : f32
    %14 = vector.broadcast %cst_6 : f32 to vector<32x176xf32>
    %15 = arith.maximumf %13, %14 : vector<32x176xf32>
    %16 = arith.truncf %15 : vector<32x176xf32> to vector<32x176xbf16>
    %c0_7 = arith.constant 0 : index
    %c0_8 = arith.constant 0 : index
    %c0_9 = arith.constant 0 : index
    %17 = vector.load %arg4[%c0_7, %c0_8, %c0_9] : memref<1x32x176xbf16, #tpu.memory_space<vmem>>, vector<1x32x176xbf16>
    %18 = vector.shape_cast %17 : vector<1x32x176xbf16> to vector<32x176xbf16>
    %19 = vector.shape_cast %16 : vector<32x176xbf16> to vector<1x32x176xbf16>
    tpu.vector_store %arg4[%c0_7, %c0_8, %c0_9], %19 {strides = array<i32>} : memref<1x32x176xbf16, #tpu.memory_space<vmem>>, vector<1x32x176xbf16>,
    return
  }
  func.func @transform_0(%arg0: i32) -> (i32, i32, i32) {
    %c0_i32 = arith.constant 0 : i32
    %c0_i32_0 = arith.constant 0 : i32
    %c0_i32_1 = arith.constant 0 : i32
    return %arg0, %c0_i32, %c0_i32_0 : i32, i32, i32
  }
  func.func @transform_1(%arg0: i32) -> (i32, i32) {
    %c0_i32 = arith.constant 0 : i32
    %c0_i32_0 = arith.constant 0 : i32
    %c0_i32_1 = arith.constant 0 : i32
    return %c0_i32, %c0_i32_0 : i32, i32
  }
  func.func @transform_2(%arg0: i32) -> (i32, i32) {
    %c0_i32 = arith.constant 0 : i32
    %c0_i32_0 = arith.constant 0 : i32
    %c0_i32_1 = arith.constant 0 : i32
    return %c0_i32, %c0_i32_0 : i32, i32
  }
  func.func @transform_3(%arg0: i32) -> (i32, i32, i32) {
    %c0_i32 = arith.constant 0 : i32
    %c0_i32_0 = arith.constant 0 : i32
    %c0_i32_1 = arith.constant 0 : i32
    return %arg0, %c0_i32, %c0_i32_0 : i32, i32, i32
  }
}

module attributes {stable_mosaic.version = 11 : i64} {
  func.func @linear_kernel(%arg0: i32, %arg1: memref<2x5632xbf16, #tpu.memory_space<vmem>>, %arg2: memref<5632x128xbf16, #tpu.memory_space<vmem>>, %arg3: memref<1x128xf32, #tpu.memory_space<vmem>>, %arg4: memref<2x128xf32, #tpu.memory_space<vmem>>) attributes {dimension_semantics = [#tpu.dimension_semantics<parallel>], iteration_bounds = array<i64: 1>, scalar_prefetch = 0 : i64, scratch_operands = 0 : i64, tpu.core_type = #tpu.core_type<tc>, window_params = [{transform_indices = @transform_0, window_bounds = array<i64: 2, 5632>}, {pipeline_mode = #tpu.pipeline_mode<synchronous>, transform_indices = @transform_1, window_bounds = array<i64: 5632, 128>}, {pipeline_mode = #tpu.pipeline_mode<synchronous>, transform_indices = @transform_2, window_bounds = array<i64: 1, 128>}, {transform_indices = @transform_3, window_bounds = array<i64: 2, 128>}]} {
    %c0 = arith.constant 0 : index
    %c0_0 = arith.constant 0 : index
    %0 = vector.load %arg1[%c0, %c0_0] : memref<2x5632xbf16, #tpu.memory_space<vmem>>, vector<2x5632xbf16>
    %c0_1 = arith.constant 0 : index
    %c0_2 = arith.constant 0 : index
    %1 = vector.load %arg2[%c0_1, %c0_2] : memref<5632x128xbf16, #tpu.memory_space<vmem>>, vector<5632x128xbf16>
    %cst = arith.constant dense<0.000000e+00> : vector<2x128xf32>
    %2 = tpu.matmul %0, %1, %cst {dimension_numbers = #tpu.dot_dimension_numbers<[1], [0], [0], [1], [0, 0, 1, 1], [], []>} : vector<2x5632xbf16>, vector<5632x128xbf16>, vector<2x128xf32> -> vector<2x128xf32>
    %c0_3 = arith.constant 0 : index
    %c0_4 = arith.constant 0 : index
    %3 = vector.load %arg3[%c0_3, %c0_4] : memref<1x128xf32, #tpu.memory_space<vmem>>, vector<1x128xf32>
    %4 = vector.broadcast %3 : vector<1x128xf32> to vector<2x128xf32>
    %5 = arith.addf %2, %4 : vector<2x128xf32>
    %c0_5 = arith.constant 0 : index
    %c0_6 = arith.constant 0 : index
    %6 = vector.load %arg4[%c0_5, %c0_6] : memref<2x128xf32, #tpu.memory_space<vmem>>, vector<2x128xf32>
    tpu.vector_store %arg4[%c0_5, %c0_6], %5 {strides = array<i32>} : memref<2x128xf32, #tpu.memory_space<vmem>>, vector<2x128xf32>,
    return
  }
  func.func @transform_0(%arg0: i32) -> (i32, i32) {
    %c0_i32 = arith.constant 0 : i32
    %c0_i32_0 = arith.constant 0 : i32
    return %arg0, %c0_i32 : i32, i32
  }
  func.func @transform_1(%arg0: i32) -> (i32, i32) {
    %c0_i32 = arith.constant 0 : i32
    %c0_i32_0 = arith.constant 0 : i32
    %c0_i32_1 = arith.constant 0 : i32
    return %c0_i32, %c0_i32_0 : i32, i32
  }
  func.func @transform_2(%arg0: i32) -> (i32, i32) {
    %c0_i32 = arith.constant 0 : i32
    %c0_i32_0 = arith.constant 0 : i32
    %c0_i32_1 = arith.constant 0 : i32
    return %c0_i32, %c0_i32_0 : i32, i32
  }
  func.func @transform_3(%arg0: i32) -> (i32, i32) {
    %c0_i32 = arith.constant 0 : i32
    %c0_i32_0 = arith.constant 0 : i32
    return %arg0, %c0_i32 : i32, i32
  }
}

</mosaic_0001>

<bundles_post_ra>
// kernel: vanilla_cnn_forward.2
= control target key start
LH: loop header
LB: loop body
LE: loop exit
PB: predicated region body
PF: predicated region fallthrough
CT: control target
= control target key end

     0   :  { %s1240_s12 = smov 0   ;;  %s1454_s0 = inlined_call_operand.vmem [shape: bf16[2,160,704], index: 0, kind: input, shape index: {}]   ;;  %s1455_s1 = inlined_call_operand.vmem [shape: bf16[32,160], index: 1, kind: input, shape index: {}]   ;;  %s1456_s2 = inlined_call_operand.vmem [shape: f32[32,1], index: 2, kind: input, shape index: {}]   ;;  %s1457_s3 = inlined_call_operand.vmem [shape: bf16[2,32,176], index: 3, kind: output, shape index: {}]  }
   0x1 LB: > { %s988_s13 = sadd.s32 4294967295, %s1214_s12   ;;  %p992_p0 = scmp.ge.s32.totalorder %s1214_s12, 1  ;;  %s1214_s12 = sphi %s1240_s12, %s13_s12  }
   0x2   : > { %p137_p1 = scmp.lt.s32.totalorder %s1214_s12, 3 }
   0x4   : > { %p138_p2 = pnand %p992_p0, %p137_p1 }
   0x5   : > { %p161_p3 = scmp.lt.s32.totalorder (!%p138_p2), %s988_s13, 1  ;;  %s1217_s7 = smov (!%p138_p2), 80  }
   0x6   : > { %141 = sbr.rel (%p138_p2) target bundleno = 434 (0x1b2), region = 32  ;;  %s1218_s8 = smov (!%p138_p2), 32  }
   0x7   : > { %s1219_s9 = smov (!%p138_p2), 112  }
   0xb   : > { %v1251_v0 = vld [vmem:[%s1455_s1 + $0x4] ss:$8 sps:$4 sm:$0xff]   ;;  %vm554_vm0 = vcmask 261120   ;;  %s1461_s13 = smov (!%p161_p3, %s988_s13), 1  ;;  %v1216_v2 = vmov 0   ;;  %v865_v4 = vld [vmem:[%s1456_s2 + $0x18] sm:$0xff] }
   0xc   : > { %1060 = vmatprep.mubr.msk.bf16.mxu0 %vm554_vm0, %v1251_v0  ;;  %1062 = vmatprep.mubr.msk.bf16.mxu1 %vm554_vm0, %v1251_v0  ;;  %v862_v1 = vld [vmem:[%s1456_s2] sm:$0xff]  ;;  %v863_v3 = vld [vmem:[%s1456_s2 + $0x8] sm:$0xff]  ;;  %s1097_s20 = smul.u32 480, %s1461_s13  ;;  %v864_v5 = vld [vmem:[%s1456_s2 + $0x10] sm:$0xff]  ;;  %vm744_vm1 = vcmask 654336   ;;  %vm841_vm2 = vcmask 916480  }
   0xd   : > { %1110 = vset.pattern.permute.xlu0 %v1216_v2  ;;  %1111 = vset.pattern.permute.xlu1 %v1216_v2  ;;  %v1321_v47 = vld [vmem:[%s1455_s1] ss:$8 sps:$4 sm:$0xff]   ;;  %v1187_v50 = vld [vmem:[%s1455_s1 + $0x14] ss:$8 sps:$4 sm:$0xff]   ;;  %v1189_v53 = vld [vmem:[%s1455_s1 + $0x10] ss:$8 sps:$4 sm:$0xff]  }
   0xe   : > { %868 = vperm.xlu0 %1110, %v862_v1   ;;  %873 = vperm.xlu1 %1111, %v863_v3   ;;  %s1275_s27 = scalar_lea.vmem %s1454_s0, %s1097_s20  ;;  %vm926_vm3 = vcmask 1043456   ;;  %s1072_s10 = sshll.u32 %s1461_s13, 5  ;;  %vm927_vm4 = vcmask 392196  }
   0xf   : > { %v1112_v6 = vld [vmem:[%s1275_s27 + $0x154] ss:$24 sps:$4 sm:$0xff]   ;;  %v1116_v8 = vld [vmem:[%s1275_s27 + $0x150] ss:$24 sps:$4 sm:$0xff]   ;;  %v1118_v10 = vld [vmem:[%s1275_s27 + $0x124] ss:$24 sps:$4 sm:$0xff]   ;;  %s1419_s14 = scalar_lea.vmem %s1457_s3, %s1072_s10 }
  0x10   : > { %v1114_v7 = vld [vmem:[%s1275_s27 + $0x15c] ss:$24 sps:$4 sm:$0xff]   ;;  %561 = vmatprep.subr.bf16.mxu0 %v1112_v6  ;;  %v1117_v9 = vld [vmem:[%s1275_s27 + $0x158] ss:$24 sps:$4 sm:$0xff]   ;;  %v1120_v11 = vld [vmem:[%s1275_s27 + $0x12c] ss:$24 sps:$4 sm:$0xff]  }
  0x11   : > { %614 = vmatprep.subr.bf16.mxu1 %v1114_v7  ;;  %562 = vmatpush1.bf16.msra.mxu0 %v1116_v8  ;;  %v1122_v12 = vld [vmem:[%s1275_s27 + $0x120] ss:$24 sps:$4 sm:$0xff]   ;;  %v1124_v14 = vld [vmem:[%s1275_s27 + $0xf4] ss:$24 sps:$4 sm:$0xff]   ;;  %v1128_v16 = vld [vmem:[%s1275_s27 + $0xf0] ss:$24 sps:$4 sm:$0xff]  }
  0x12   : > { %883 = vperm.xlu0 %1110, %v865_v4   ;;  %878 = vperm.xlu1 %1111, %v864_v5   ;;  %v1123_v13 = vld [vmem:[%s1275_s27 + $0x128] ss:$24 sps:$4 sm:$0xff]   ;;  %v1126_v15 = vld [vmem:[%s1275_s27 + $0xfc] ss:$24 sps:$4 sm:$0xff]   ;;  %v1129_v17 = vld [vmem:[%s1275_s27 + $0xf8] ss:$24 sps:$4 sm:$0xff]  }
  0x13   : > { %615 = vmatpush1.bf16.msra.mxu1 %v1117_v9  ;;  %563 = vmatprep.subr.bf16.mxu0 %v1118_v10  ;;  %v1130_v18 = vld [vmem:[%s1275_s27 + $0xc4] ss:$24 sps:$4 sm:$0xff]   ;;  %v1134_v20 = vld [vmem:[%s1275_s27 + $0xc0] ss:$24 sps:$4 sm:$0xff]   ;;  %v1136_v22 = vld [vmem:[%s1275_s27 + $0x94] ss:$24 sps:$4 sm:$0xff]  }
  0x14   : > { %616 = vmatprep.subr.bf16.mxu1 %v1120_v11  ;;  %v1132_v19 = vld [vmem:[%s1275_s27 + $0xcc] ss:$24 sps:$4 sm:$0xff]   ;;  %v1135_v21 = vld [vmem:[%s1275_s27 + $0xc8] ss:$24 sps:$4 sm:$0xff]   ;;  %v1138_v23 = vld [vmem:[%s1275_s27 + $0x9c] ss:$24 sps:$4 sm:$0xff]  }
  0x15   : > { %564 = vmatpush1.bf16.msra.mxu0 %v1122_v12  ;;  %v1140_v24 = vld [vmem:[%s1275_s27 + $0x90] ss:$24 sps:$4 sm:$0xff]   ;;  %v1142_v26 = vld [vmem:[%s1275_s27 + $0x64] ss:$24 sps:$4 sm:$0xff]   ;;  %v1146_v28 = vld [vmem:[%s1275_s27 + $0x60] ss:$24 sps:$4 sm:$0xff]  }
  0x16   : > { %565 = vmatprep.subr.bf16.mxu0 %v1124_v14  ;;  %v1141_v25 = vld [vmem:[%s1275_s27 + $0x98] ss:$24 sps:$4 sm:$0xff]   ;;  %v1144_v27 = vld [vmem:[%s1275_s27 + $0x6c] ss:$24 sps:$4 sm:$0xff]   ;;  %v1147_v29 = vld [vmem:[%s1275_s27 + $0x68] ss:$24 sps:$4 sm:$0xff]  }
  0x17   : > { %617 = vmatpush1.bf16.msra.mxu1 %v1123_v13  ;;  %v1148_v30 = vld [vmem:[%s1275_s27 + $0x34] ss:$24 sps:$4 sm:$0xff]   ;;  %v1152_v32 = vld [vmem:[%s1275_s27 + $0x30] ss:$24 sps:$4 sm:$0xff]   ;;  %v1154_v34 = vld [vmem:[%s1275_s27 + $0x4] ss:$24 sps:$4 sm:$0xff]  }
  0x18   : > { %618 = vmatprep.subr.bf16.mxu1 %v1126_v15  ;;  %v1150_v31 = vld [vmem:[%s1275_s27 + $0x3c] ss:$24 sps:$4 sm:$0xff]   ;;  %v1153_v33 = vld [vmem:[%s1275_s27 + $0x38] ss:$24 sps:$4 sm:$0xff]   ;;  %v1156_v35 = vld [vmem:[%s1275_s27 + $0xc] ss:$24 sps:$4 sm:$0xff]  }
  0x19   : > { %566 = vmatpush1.bf16.msra.mxu0 %v1128_v16  ;;  %v1158_v36 = vld [vmem:[%s1275_s27] ss:$24 sps:$4 sm:$0xff]   ;;  %v1160_v38 = vld [vmem:[%s1275_s27 + $0x1b4] ss:$24 sps:$4 sm:$0xff]   ;;  %v1164_v40 = vld [vmem:[%s1275_s27 + $0x1b0] ss:$24 sps:$4 sm:$0xff]  }
  0x1a   : > { %567 = vmatprep.subr.bf16.mxu0 %v1130_v18  ;;  %v1159_v37 = vld [vmem:[%s1275_s27 + $0x8] ss:$24 sps:$4 sm:$0xff]   ;;  %v1162_v39 = vld [vmem:[%s1275_s27 + $0x1bc] ss:$24 sps:$4 sm:$0xff]   ;;  %v1165_v41 = vld [vmem:[%s1275_s27 + $0x1b8] ss:$24 sps:$4 sm:$0xff]  }
  0x1b   : > { %619 = vmatpush1.bf16.msra.mxu1 %v1129_v17  ;;  %v1166_v42 = vld [vmem:[%s1275_s27 + $0x184] ss:$24 sps:$4 sm:$0xff]   ;;  %v1170_v44 = vld [vmem:[%s1275_s27 + $0x180] ss:$24 sps:$4 sm:$0xff]   ;;  %v1180_v49 = vld [vmem:[%s1275_s27 + $0x134] ss:$24 sps:$4 sm:$0xff]  }
  0x1c   : > { %620 = vmatprep.subr.bf16.mxu1 %v1132_v19  ;;  %v1168_v43 = vld [vmem:[%s1275_s27 + $0x18c] ss:$24 sps:$4 sm:$0xff]   ;;  %v1171_v45 = vld [vmem:[%s1275_s27 + $0x188] ss:$24 sps:$4 sm:$0xff]   ;;  %vm1422_vm5 = vmor %vm927_vm4, %vm926_vm3 }
  0x1d   : > { %568 = vmatpush1.bf16.msra.mxu0 %v1134_v20  ;;  %v1177_v46 = vld [vmem:[%s1275_s27 + $0x164] ss:$24 sps:$4 sm:$0xff]   ;;  %v1175_v48 = vld [vmem:[%s1275_s27 + $0x160] ss:$24 sps:$4 sm:$0xff]   ;;  %v1178_v51 = vld [vmem:[%s1275_s27 + $0x130] ss:$24 sps:$4 sm:$0xff]  }
  0x1e   : > { %569 = vmatprep.subr.bf16.mxu0 %v1136_v22  ;;  %v1183_v52 = vld [vmem:[%s1275_s27 + $0x104] ss:$24 sps:$4 sm:$0xff]   ;;  %v1181_v54 = vld [vmem:[%s1275_s27 + $0x100] ss:$24 sps:$4 sm:$0xff]   ;;  %v1186_v55 = vld [vmem:[%s1275_s27 + $0xd4] ss:$24 sps:$4 sm:$0xff]  }
  0x1f   : > { %621 = vmatpush1.bf16.msra.mxu1 %v1135_v21  ;;  %v1184_v56 = vld [vmem:[%s1275_s27 + $0xd0] ss:$24 sps:$4 sm:$0xff]   ;;  %v1192_v57 = vld [vmem:[%s1275_s27 + $0xa4] ss:$24 sps:$4 sm:$0xff]   ;;  %v1190_v58 = vld [vmem:[%s1275_s27 + $0xa0] ss:$24 sps:$4 sm:$0xff]  }
  0x20   : > { %622 = vmatprep.subr.bf16.mxu1 %v1138_v23  ;;  %v1195_v59 = vld [vmem:[%s1275_s27 + $0x74] ss:$24 sps:$4 sm:$0xff]   ;;  %v1193_v60 = vld [vmem:[%s1275_s27 + $0x70] ss:$24 sps:$4 sm:$0xff]   ;;  %v1198_v61 = vld [vmem:[%s1275_s27 + $0x44] ss:$24 sps:$4 sm:$0xff]  }
  0x21   : > { %570 = vmatpush1.bf16.msra.mxu0 %v1140_v24  ;;  %v1196_v62 = vld [vmem:[%s1275_s27 + $0x40] ss:$24 sps:$4 sm:$0xff]   ;;  %v1201_v63 = vld [vmem:[%s1275_s27 + $0x14] ss:$24 sps:$4 sm:$0xff]   ;;  %v1204_v1 = vld [vmem:[%s1275_s27 + $0x1c4] ss:$24 sps:$4 sm:$0xff]  }
  0x22   : > { %571 = vmatprep.subr.bf16.mxu0 %v1142_v26  ;;  %v1202_v2 = vld [vmem:[%s1275_s27 + $0x1c0] ss:$24 sps:$4 sm:$0xff]   ;;  %v1207_v3 = vld [vmem:[%s1275_s27 + $0x194] ss:$24 sps:$4 sm:$0xff]   ;;  %v1205_v4 = vld [vmem:[%s1275_s27 + $0x190] ss:$24 sps:$4 sm:$0xff]  }
  0x23   : > { %623 = vmatpush1.bf16.msra.mxu1 %v1141_v25 }
  0x24   : > { %624 = vmatprep.subr.bf16.mxu1 %v1144_v27 }
  0x25   : > { %572 = vmatpush1.bf16.msra.mxu0 %v1146_v28 }
  0x26   : > { %573 = vmatprep.subr.bf16.mxu0 %v1148_v30 }
  0x27   : > { %625 = vmatpush1.bf16.msra.mxu1 %v1147_v29 }
  0x28   : > { %626 = vmatprep.subr.bf16.mxu1 %v1150_v31 }
  0x29   : > { %574 = vmatpush1.bf16.msra.mxu0 %v1152_v32 }
  0x2a   : > { %575 = vmatprep.subr.bf16.mxu0 %v1154_v34 }
  0x2b   : > { %627 = vmatpush1.bf16.msra.mxu1 %v1153_v33 }
  0x2c   : > { %628 = vmatprep.subr.bf16.mxu1 %v1156_v35 }
  0x2d   : > { %576 = vmatpush1.bf16.msra.mxu0 %v1158_v36 }
  0x2e   : > { %589 = vmatprep.subr.bf16.mxu0 %v1160_v38 }
  0x2f   : > { %629 = vmatpush1.bf16.msra.mxu1 %v1159_v37 }
  0x30   : > { %642 = vmatprep.subr.bf16.mxu1 %v1162_v39 }
  0x31   : > { %590 = vmatpush2.bf16.msra.mxu0 %v1164_v40 }
  0x32   : > { %591 = vmatprep.subr.bf16.mxu0 %v1166_v42 }
  0x33   : > { %643 = vmatpush2.bf16.msra.mxu1 %v1165_v41 }
  0x34   : > { %644 = vmatprep.subr.bf16.mxu1 %v1168_v43 }
  0x35   : > { %592 = vmatpush2.bf16.msra.mxu0 %v1170_v44 }
  0x36   : > { %667 = vmatprep.subr.bf16.mxu0 %v1177_v46 }
  0x37   : > { %645 = vmatpush2.bf16.msra.mxu1 %v1171_v45 }
  0x38   : > { %1077 = vmatprep.subr.bf16.mxu1 %v1177_v46  ;;  %594 = vmatmul.mubr.bf16.vlgmr.msra.gmra.mxu0 %v1321_v47 }
  0x39   : > { %668 = vmatpush1.bf16.msra.mxu0 %v1175_v48  ;;  %1061 = vmatprep.mubr.msk.bf16.mxu0 %vm554_vm0, %v1187_v50 }
  0x3a   : > { %647 = vmatmul.mubr.bf16.vlgmr.msra.gmra.mxu1 %v1321_v47  ;;  %669 = vmatprep.subr.bf16.mxu0 %v1180_v49 }
  0x3b   : > { %1087 = vmatpush1.bf16.msra.mxu1 %v1175_v48  ;;  %1063 = vmatprep.mubr.msk.bf16.mxu1 %vm554_vm0, %v1187_v50 }
  0x3c   : > { %1078 = vmatprep.subr.bf16.mxu1 %v1180_v49 }
  0x3d   : > { %670 = vmatpush1.bf16.msra.mxu0 %v1178_v51 }
  0x3e   : > { %671 = vmatprep.subr.bf16.mxu0 %v1183_v52 }
  0x3f   : > { %1088 = vmatpush1.bf16.msra.mxu1 %v1178_v51 }
  0x40   : > { %1079 = vmatprep.subr.bf16.mxu1 %v1183_v52  ;;  %604 = vmatmul.mubr.bf16.gmra.mxu0 %v1189_v53 }
  0x41   : > { %672 = vmatpush1.bf16.msra.mxu0 %v1181_v54  ;;  %1064 = vmatprep.mubr.msk.bf16.mxu0 %vm554_vm0, %v1251_v0  ;;  %v1199_v0 = vld [vmem:[%s1275_s27 + $0x10] ss:$24 sps:$4 sm:$0xff]  }
  0x42   : > { %657 = vmatmul.mubr.bf16.gmra.mxu1 %v1189_v53  ;;  %673 = vmatprep.subr.bf16.mxu0 %v1186_v55 }
  0x43   : > { %1089 = vmatpush1.bf16.msra.mxu1 %v1181_v54  ;;  %1065 = vmatprep.mubr.msk.bf16.mxu1 %vm554_vm0, %v1187_v50 }
  0x44   : > { %1080 = vmatprep.subr.bf16.mxu1 %v1186_v55 }
  0x45   : > { %674 = vmatpush1.bf16.msra.mxu0 %v1184_v56 }
  0x46   : > { %675 = vmatprep.subr.bf16.mxu0 %v1192_v57 }
  0x47   : > { %1090 = vmatpush1.bf16.msra.mxu1 %v1184_v56 }
  0x48   : > { %1081 = vmatprep.subr.bf16.mxu1 %v1192_v57 }
  0x49   : > { %676 = vmatpush1.bf16.msra.mxu0 %v1190_v58 }
  0x4a   : > { %677 = vmatprep.subr.bf16.mxu0 %v1195_v59 }
  0x4b   : > { %1091 = vmatpush1.bf16.msra.mxu1 %v1190_v58 }
  0x4c   : > { %1082 = vmatprep.subr.bf16.mxu1 %v1195_v59 }
  0x4d   : > { %678 = vmatpush1.bf16.msra.mxu0 %v1193_v60 }
  0x4e   : > { %679 = vmatprep.subr.bf16.mxu0 %v1198_v61 }
  0x4f   : > { %1092 = vmatpush1.bf16.msra.mxu1 %v1193_v60 }
  0x50   : > { %1083 = vmatprep.subr.bf16.mxu1 %v1198_v61 }
  0x51   : > { %680 = vmatpush1.bf16.msra.mxu0 %v1196_v62 }
  0x52   : > { %681 = vmatprep.subr.bf16.mxu0 %v1201_v63 }
  0x53   : > { %1093 = vmatpush1.bf16.msra.mxu1 %v1196_v62 }
  0x54   : > { %1084 = vmatprep.subr.bf16.mxu1 %v1201_v63 }
  0x55   : > { %682 = vmatpush1.bf16.msra.mxu0 %v1199_v0 }
  0x56   : > { %695 = vmatprep.subr.bf16.mxu0 %v1204_v1 }
  0x57   : > { %1094 = vmatpush1.bf16.msra.mxu1 %v1199_v0 }
  0x58   : > { %1085 = vmatprep.subr.bf16.mxu1 %v1204_v1 }
  0x59   : > { %696 = vmatpush2.bf16.msra.mxu0 %v1202_v2 }
  0x5a   : > { %697 = vmatprep.subr.bf16.mxu0 %v1207_v3 }
  0x5b   : > { %1095 = vmatpush2.bf16.msra.mxu1 %v1202_v2 }
  0x5c   : > { %1086 = vmatprep.subr.bf16.mxu1 %v1207_v3 }
  0x5d   : > { %698 = vmatpush2.bf16.msra.mxu0 %v1205_v4 }
  0x5f   : > { %1096 = vmatpush2.bf16.msra.mxu1 %v1205_v4 }
  0x60   : > { %700 = vmatmul.mubr.bf16.vlgmr.msra.gmra.mxu0 %v1321_v47 }
  0x62   : > { %710 = vmatmul.mubr.bf16.vlgmr.msra.gmra.mxu1 %v1189_v53 }
  0x89   : > { %v869_v29 = vpop.permute.xlu0 %868  ;;  %v1388_v30 = vpop.permute.xlu1 %873 }
  0x8d   : > { %v1390_v31 = vpop.permute.xlu0 %883  ;;  %v1392_v32 = vpop.permute.xlu1 %878 }
  0xf8   : > { %v1356_v5 = vpop.f32.mrf.mxu0 }
  0xfa   : > { %v648_v6 = vpop.f32.mrf.mxu1  ;;  %v1358_v7 = vpop.f32.mrf.mxu0 }
  0xfb   : > { %730 = vrot.lane.b32.xlu0 %v648_v6, %s1217_s7 }
  0xfc   : > { %v650_v8 = vpop.f32.mrf.mxu1  ;;  %v1361_v9 = vpop.f32.mrf.mxu0 }
  0xfd   : > { %775 = vrot.lane.b32.xlu1 %v650_v8, %s1218_s8 }
  0xfe   : > { %v652_v10 = vpop.f32.mrf.mxu1  ;;  %v1364_v11 = vpop.f32.mrf.mxu0 }
  0xff   : > { %773 = vrot.lane.b32.xlu0 %v648_v6, %s1218_s8 }
 0x100   : > { %v1367_v12 = vpop.f32.mrf.mxu0  ;;  %v654_v13 = vpop.f32.mrf.mxu1 }
 0x101   : > { %734 = vrot.lane.b32.xlu1 %v652_v10, %s1217_s7 }
 0x102   : > { %v658_v14 = vpop.f32.mrf.mxu1  ;;  %v1371_v15 = vpop.f32.mrf.mxu0 }
 0x103   : > { %728 = vrot.lane.b32.xlu0 %v1358_v7, %s1217_s7 }
 0x104   : > { %v1375_v16 = vpop.f32.mrf.mxu0  ;;  %v660_v17 = vpop.f32.mrf.mxu1 }
 0x105   : > { %779 = vrot.lane.b32.xlu1 %v652_v10, %s1218_s8 }
 0x106   : > { %v1378_v18 = vpop.f32.mrf.mxu0  ;;  %v662_v19 = vpop.f32.mrf.mxu1 }
 0x107   : > { %781 = vrot.lane.b32.xlu0 %v654_v13, %s1218_s8 }
 0x108   : > { %v664_v20 = vpop.f32.mrf.mxu1 }
 0x109   : > { %732 = vrot.lane.b32.xlu1 %v1364_v11, %s1217_s7 }
 0x10b   : > { %785 = vrot.lane.b32.xlu0 %v658_v14, %s1218_s8 }
 0x10d   : > { %738 = vrot.lane.b32.xlu1 %v658_v14, %s1217_s7 }
 0x10f   : > { %736 = vrot.lane.b32.xlu0 %v1371_v15, %s1217_s7 }
 0x111   : > { %787 = vrot.lane.b32.xlu1 %v660_v17, %s1218_s8 }
 0x113   : > { %740 = vrot.lane.b32.xlu0 %v1378_v18, %s1217_s7 }
 0x115   : > { %742 = vrot.lane.b32.xlu1 %v662_v19, %s1217_s7 }
 0x117   : > { %793 = vrot.lane.b32.xlu0 %v664_v20, %s1218_s8 }
 0x119   : > { %791 = vrot.lane.b32.xlu1 %v662_v19, %s1218_s8 }
 0x120   : > { %v701_v21 = vpop.f32.mrf.mxu0 }
 0x121   : > { %825 = vrot.lane.b32.xlu1 %v701_v21, %s1219_s9  ;;  %777 = vrot.lane.b32.xlu0 %v701_v21, %s1218_s8 }
 0x122   : > { %v711_v22 = vpop.f32.mrf.mxu1  ;;  %v703_v23 = vpop.f32.mrf.mxu0 }
 0x124   : > { %v713_v24 = vpop.f32.mrf.mxu1  ;;  %v705_v25 = vpop.f32.mrf.mxu0 }
 0x125   : > { %833 = vrot.lane.b32.xlu1 %v711_v22, %s1219_s9  ;;  %789 = vrot.lane.b32.xlu0 %v711_v22, %s1218_s8 }
 0x126   : > { %v715_v26 = vpop.f32.mrf.mxu1  ;;  %v707_v27 = vpop.f32.mrf.mxu0 }
 0x128   : > { %v717_v28 = vpop.f32.mrf.mxu1 }
 0x129   : > { %827 = vrot.lane.b32.xlu0 %v703_v23, %s1219_s9  ;;  %783 = vrot.lane.b32.xlu1 %v705_v25, %s1218_s8 }
 0x12d   : > { %835 = vrot.lane.b32.xlu0 %v713_v24, %s1219_s9  ;;  %795 = vrot.lane.b32.xlu1 %v715_v26, %s1218_s8 }
 0x131   : > { %829 = vrot.lane.b32.xlu1 %v705_v25, %s1219_s9  ;;  %831 = vrot.lane.b32.xlu0 %v707_v27, %s1219_s9 }
 0x135   : > { %837 = vrot.lane.b32.xlu1 %v715_v26, %s1219_s9  ;;  %839 = vrot.lane.b32.xlu0 %v717_v28, %s1219_s9 }
 0x16d   : > { %v731_v33 = vpop.permute.xlu0 %730 }
 0x16e   : > { %v758_v56 = vmax.f32 %v1358_v7, %v731_v33 }
 0x16f   : > { %v776_v34 = vpop.permute.xlu1 %775 }
 0x171   : > { %v774_v35 = vpop.permute.xlu0 %773 }
 0x172   : > { %v797_v58 = vsel %vm554_vm0, %v774_v35, %v776_v34 }
 0x173   : > { %v735_v36 = vpop.permute.xlu1 %734 }
 0x175   : > { %v729_v37 = vpop.permute.xlu0 %728 }
 0x176   : > { %v745_v51 = vsel %vm744_vm1, %v729_v37, %v731_v33 }
 0x177   : > { %v780_v38 = vpop.permute.xlu1 %779  ;;  %v757_v52 = vmax.f32 %v1356_v5, %v745_v51 }
 0x179   : > { %v782_v39 = vpop.permute.xlu0 %781  ;;  %v813_v63 = vmax.f32 %v757_v52, %v797_v58 }
 0x17a   : > { %v799_v23 = vsel %vm554_vm0, %v780_v38, %v782_v39 }
 0x17b   : > { %v733_v40 = vpop.permute.xlu1 %732 }
 0x17c   : > { %v746_v60 = vsel %vm744_vm1, %v733_v40, %v735_v36 }
 0x17d   : > { %v786_v41 = vpop.permute.xlu0 %785  ;;  %v759_v7 = vmax.f32 %v1361_v9, %v746_v60 }
 0x17f   : > { %v739_v42 = vpop.permute.xlu1 %738  ;;  %v815_v28 = vmax.f32 %v759_v7, %v799_v23 }
 0x180   : > { %v762_v2 = vmax.f32 %v1371_v15, %v739_v42  ;;  %v760_v15 = vmax.f32 %v1364_v11, %v735_v36 }
 0x181   : > { %v737_v43 = vpop.permute.xlu0 %736 }
 0x182   : > { %v747_v57 = vsel %vm744_vm1, %v737_v43, %v739_v42 }
 0x183   : > { %v788_v44 = vpop.permute.xlu1 %787  ;;  %v761_v61 = vmax.f32 %v1367_v12, %v747_v57 }
 0x184   : > { %v801_v3 = vsel %vm554_vm0, %v786_v41, %v788_v44 }
 0x185   : > { %v741_v45 = vpop.permute.xlu0 %740  ;;  %v817_v13 = vmax.f32 %v761_v61, %v801_v3 }
 0x187   : > { %v1394_v46 = vpop.permute.xlu1 %742 }
 0x188   : > { %v748_v25 = vsel %vm744_vm1, %v741_v45, %v1394_v46 }
 0x189   : > { %v794_v47 = vpop.permute.xlu0 %793  ;;  %v763_v42 = vmax.f32 %v1375_v16, %v748_v25 }
 0x18b   : > { %v792_v48 = vpop.permute.xlu1 %791 }
 0x18c   : > { %v803_v38 = vsel %vm554_vm0, %v792_v48, %v794_v47 }
 0x18d   : > { %v819_v45 = vmax.f32 %v763_v42, %v803_v38 }
 0x193   : > { %v826_v49 = vpop.permute.xlu1 %825  ;;  %v778_v50 = vpop.permute.xlu0 %777 }
 0x194   : > { %v798_v53 = vsel %vm554_vm0, %v776_v34, %v778_v50 }
 0x195   : > { %v814_v59 = vmax.f32 %v758_v56, %v798_v53 }
 0x197   : > { %v834_v54 = vpop.permute.xlu1 %833  ;;  %v790_v55 = vpop.permute.xlu0 %789 }
 0x198   : > { %v802_v62 = vsel %vm554_vm0, %v788_v44, %v790_v55 }
 0x199   : > { %v818_v8 = vmax.f32 %v762_v2, %v802_v62 }
 0x19b   : > { %v828_v0 = vpop.permute.xlu0 %827  ;;  %v784_v1 = vpop.permute.xlu1 %783 }
 0x19c   : > { %v842_v4 = vsel %vm841_vm2, %v826_v49, %v828_v0  ;;  %v855_v5 = vmax.f32 %v814_v59, %v828_v0  ;;  %v800_v14 = vsel %vm554_vm0, %v782_v39, %v784_v1 }
 0x19d   : > { %v854_v6 = vmax.f32 %v813_v63, %v842_v4  ;;  %v816_v26 = vmax.f32 %v760_v15, %v800_v14 }
 0x19e   : > { %v887_v10 = vadd.f32 %v869_v29, %v855_v5 }
 0x19f   : > { %v886_v12 = vadd.f32 %v869_v29, %v854_v6  ;;  %v836_v17 = vpop.permute.xlu0 %835  ;;  %v796_v19 = vpop.permute.xlu1 %795  ;;  %v764_v29 = vmax.f32 %v1378_v18, %v1394_v46 }
 0x1a0   : > { %v895_v20 = vmax.f32 %v887_v10, 0.0  ;;  %v844_v21 = vsel %vm841_vm2, %v834_v54, %v836_v17  ;;  %v859_v22 = vmax.f32 %v818_v8, %v836_v17  ;;  %v804_v35 = vsel %vm554_vm0, %v794_v47, %v796_v19 }
 0x1a1   : > { %v894_v9 = vmax.f32 %v886_v12, 0.0  ;;  %v858_v24 = vmax.f32 %v817_v13, %v844_v21  ;;  %v820_v44 = vmax.f32 %v764_v29, %v804_v35 }
 0x1a2   : > { %v891_v27 = vadd.f32 %v1392_v32, %v859_v22 }
 0x1a3   : > { %v1073_v33 = vpack.c.bf16 %v895_v20, %v894_v9  ;;  %v890_v34 = vadd.f32 %v1392_v32, %v858_v24  ;;  %v830_v36 = vpop.permute.xlu1 %829  ;;  %v832_v37 = vpop.permute.xlu0 %831 }
 0x1a4   : > { %v899_v39 = vmax.f32 %v891_v27, 0.0  ;;  %v843_v40 = vsel %vm841_vm2, %v830_v36, %v832_v37  ;;  %v857_v41 = vmax.f32 %v816_v26, %v832_v37 }
 0x1a5   : > { %929 = vst.msk [vmem:[%s1419_s14] sm:$0xff] %vm1422_vm5, %v1073_v33  ;;  %v898_v18 = vmax.f32 %v890_v34, 0.0  ;;  %v856_v43 = vmax.f32 %v815_v28, %v843_v40 }
 0x1a6   : > { %v889_v32 = vadd.f32 %v1388_v30, %v857_v41 }
 0x1a7   : > { %v1075_v46 = vpack.c.bf16 %v899_v39, %v898_v18  ;;  %v888_v47 = vadd.f32 %v1388_v30, %v856_v43  ;;  %v838_v48 = vpop.permute.xlu1 %837  ;;  %v840_v49 = vpop.permute.xlu0 %839 }
 0x1a8   : > { %v897_v50 = vmax.f32 %v889_v32, 0.0  ;;  %v845_v51 = vsel %vm841_vm2, %v838_v48, %v840_v49  ;;  %v861_v16 = vmax.f32 %v820_v44, %v840_v49 }
 0x1a9   : > { %931 = vst.msk [vmem:[%s1419_s14 + $0x10] sm:$0xff] %vm1422_vm5, %v1075_v46  ;;  %v896_v52 = vmax.f32 %v888_v47, 0.0  ;;  %v860_v53 = vmax.f32 %v819_v45, %v845_v51 }
 0x1aa   : > { %v893_v54 = vadd.f32 %v1390_v31, %v861_v16 }
 0x1ab   : > { %v1074_v55 = vpack.c.bf16 %v897_v50, %v896_v52  ;;  %v892_v56 = vadd.f32 %v1390_v31, %v860_v53 }
 0x1ac   : > { %v901_v57 = vmax.f32 %v893_v54, 0.0 }
 0x1ad   : > { %930 = vst.msk [vmem:[%s1419_s14 + $0x8] sm:$0xff] %vm1422_vm5, %v1074_v55  ;;  %v900_v30 = vmax.f32 %v892_v56, 0.0 }
 0x1af   : > { %v1076_v58 = vpack.c.bf16 %v901_v57, %v900_v30 }
 0x1b1   : > { %932 = vst.msk [vmem:[%s1419_s14 + $0x18] sm:$0xff] %vm1422_vm5, %v1076_v58 }
 0x1b2 PF: > { %s13_s12 = sadd.s32 1, %s1214_s12  }
 0x1b3   : > { %p10_p4 = scmp.ge.s32.totalorder %s13_s12, 4  }
 0x1b5   :  { %12 = sbr.rel (!%p10_p4) target bundleno = 1 (0x1), region = 62 }

// kernel: vanilla_cnn_forward.3
= control target key start
LH: loop header
LB: loop body
LE: loop exit
PB: predicated region body
PF: predicated region fallthrough
CT: control target
= control target key end

     0   :  { %v743_v28 = vlaneseq  ;;  %v5278_v36 = vmov 1966171168   ;;  %s6448_s0 = inlined_call_operand.vmem [shape: bf16[2,5632], index: 0, kind: input, shape index: {}]   ;;  %s6449_s1 = inlined_call_operand.vmem [shape: bf16[5632,128], index: 1, kind: input, shape index: {}]   ;;  %s6450_s2 = inlined_call_operand.vmem [shape: f32[1,128], index: 2, kind: input, shape index: {}]   ;;  %s6451_s3 = inlined_call_operand.hbm [shape: f32[2,128], index: 3, kind: output, shape index: {}]  }
   0x1   :  { %v4899_v0 = vld [vmem:[%s6449_s1 + $0x78] sm:$0xff]   ;;  %v4903_v4 = vld [vmem:[%s6449_s1 + $0x70] sm:$0xff]   ;;  %v4907_v8 = vld [vmem:[%s6449_s1 + $0x68] sm:$0xff]   ;;  %v741_v37 = vunpack.c.l.s4 %v5278_v36 }
   0x2   :  { %v4900_v1 = vld [vmem:[%s6449_s1 + $0xf8] sm:$0xff]   ;;  %4413 = vmatprep.subr.bf16.mxu0 %v4899_v0  ;;  %v4904_v5 = vld [vmem:[%s6449_s1 + $0xf0] sm:$0xff]   ;;  %v4908_v9 = vld [vmem:[%s6449_s1 + $0xe8] sm:$0xff]   ;;  %v744_v33 = vshrl.u32 %v743_v28, 7 }
   0x3   :  { %v4901_v2 = vld [vmem:[%s6449_s1 + $0x38] sm:$0xff]   ;;  %4435 = vmatprep.subr.bf16.mxu1 %v4900_v1  ;;  %v4905_v6 = vld [vmem:[%s6449_s1 + $0x30] sm:$0xff]   ;;  %v4909_v10 = vld [vmem:[%s6449_s1 + $0x28] sm:$0xff]   ;;  %v742_v40 = vunpack.c.0.s8 %v741_v37 }
   0x4   :  { %v4902_v3 = vld [vmem:[%s6449_s1 + $0xb8] sm:$0xff]   ;;  %4414 = vmatpush3.bf16.msra.mxu0 %v4901_v2  ;;  %v4906_v7 = vld [vmem:[%s6449_s1 + $0xb0] sm:$0xff]   ;;  %v4910_v11 = vld [vmem:[%s6449_s1 + $0xa8] sm:$0xff]  }
   0x5   :  { %4436 = vmatpush3.bf16.msra.mxu1 %v4902_v3  ;;  %4415 = vmatprep.subr.bf16.mxu0 %v4903_v4  ;;  %v4911_v12 = vld [vmem:[%s6449_s1 + $0x60] sm:$0xff]   ;;  %v4915_v16 = vld [vmem:[%s6449_s1 + $0x58] sm:$0xff]   ;;  %v4919_v20 = vld [vmem:[%s6449_s1 + $0x50] sm:$0xff]   ;;  %v5405_v41 = vsub.s32 %v742_v40, %v744_v33 }
   0x6   :  { %4437 = vmatprep.subr.bf16.mxu1 %v4904_v5  ;;  %v4912_v13 = vld [vmem:[%s6449_s1 + $0xe0] sm:$0xff]   ;;  %v4916_v17 = vld [vmem:[%s6449_s1 + $0xd8] sm:$0xff]   ;;  %v4920_v21 = vld [vmem:[%s6449_s1 + $0xd0] sm:$0xff]  }
   0x7   :  { %v4913_v14 = vld [vmem:[%s6449_s1 + $0x20] sm:$0xff]   ;;  %v4917_v18 = vld [vmem:[%s6449_s1 + $0x18] sm:$0xff]   ;;  %v4921_v22 = vld [vmem:[%s6449_s1 + $0x10] sm:$0xff]  }
   0x8   :  { %4416 = vmatpush3.bf16.msra.mxu0 %v4905_v6  ;;  %v4914_v15 = vld [vmem:[%s6449_s1 + $0xa0] sm:$0xff]   ;;  %v4918_v19 = vld [vmem:[%s6449_s1 + $0x98] sm:$0xff]   ;;  %v4922_v23 = vld [vmem:[%s6449_s1 + $0x90] sm:$0xff]  }
   0x9   :  { %4438 = vmatpush3.bf16.msra.mxu1 %v4906_v7  ;;  %4417 = vmatprep.subr.bf16.mxu0 %v4907_v8  ;;  %v4923_v24 = vld [vmem:[%s6449_s1 + $0x48] sm:$0xff]   ;;  %v4927_v29 = vld [vmem:[%s6449_s1 + $0x40] sm:$0xff]   ;;  %v4932_v35 = vld [vmem:[%s6449_s1 + $0x178] sm:$0xff]  }
   0xa   :  { %4439 = vmatprep.subr.bf16.mxu1 %v4908_v9  ;;  %v4924_v25 = vld [vmem:[%s6449_s1 + $0xc8] sm:$0xff]   ;;  %v4928_v30 = vld [vmem:[%s6449_s1 + $0xc0] sm:$0xff]   ;;  %v4933_v38 = vld [vmem:[%s6449_s1 + $0x1f8] sm:$0xff]  }
   0xb   :  { %v4925_v26 = vld [vmem:[%s6449_s1 + $0x8] sm:$0xff]   ;;  %v4929_v31 = vld [vmem:[%s6449_s1] sm:$0xff]   ;;  %v4934_v47 = vld [vmem:[%s6449_s1 + $0x138] sm:$0xff]  }
   0xc   :  { %4418 = vmatpush3.bf16.msra.mxu0 %v4909_v10  ;;  %v4926_v27 = vld [vmem:[%s6449_s1 + $0x88] sm:$0xff]   ;;  %v4930_v32 = vld [vmem:[%s6449_s1 + $0x80] sm:$0xff]   ;;  %v4935_v49 = vld [vmem:[%s6449_s1 + $0x1b8] sm:$0xff]  }
   0xd   :  { %4440 = vmatpush3.bf16.msra.mxu1 %v4910_v11  ;;  %4419 = vmatprep.subr.bf16.mxu0 %v4911_v12  ;;  %v16_v34 = vld [vmem:[%s6448_s0] sm:$0xff]  ;;  %v4936_v52 = vld [vmem:[%s6449_s1 + $0x170] sm:$0xff]   ;;  %v4940_v58 = vld [vmem:[%s6449_s1 + $0x168] sm:$0xff]  }
   0xe   :  { %4441 = vmatprep.subr.bf16.mxu1 %v4912_v13  ;;  %v739_v39 = vcombine.high %v16_v34, %v16_v34  ;;  %v746_v42 = vrot.slane %v16_v34, %v5405_v41  ;;  %v4937_v54 = vld [vmem:[%s6449_s1 + $0x1f0] sm:$0xff]   ;;  %v4941_v59 = vld [vmem:[%s6449_s1 + $0x1e8] sm:$0xff]   ;;  %v4944_v62 = vld [vmem:[%s6449_s1 + $0x160] sm:$0xff]  }
   0xf   :  { %v4938_v55 = vld [vmem:[%s6449_s1 + $0x130] sm:$0xff]   ;;  %v4942_v60 = vld [vmem:[%s6449_s1 + $0x128] sm:$0xff]   ;;  %v4945_v63 = vld [vmem:[%s6449_s1 + $0x1e0] sm:$0xff]  }
  0x10   :  { %4420 = vmatpush3.bf16.msra.mxu0 %v4913_v14  ;;  %v5409_v43 = vrot.slane %v739_v39, %v5405_v41  ;;  %v754_v44 = vcombine.high %v746_v42, %v746_v42  ;;  %v762_v45 = vrot.slane %v746_v42, %v5405_v41  ;;  %v4939_v57 = vld [vmem:[%s6449_s1 + $0x1b0] sm:$0xff]   ;;  %v4943_v61 = vld [vmem:[%s6449_s1 + $0x1a8] sm:$0xff]   ;;  %v4946_v0 = vld [vmem:[%s6449_s1 + $0x120] sm:$0xff]  }
  0x11   :  { %4442 = vmatpush3.bf16.msra.mxu1 %v4914_v15  ;;  %4421 = vmatprep.subr.bf16.mxu0 %v4915_v16  ;;  %v4947_v1 = vld [vmem:[%s6449_s1 + $0x1a0] sm:$0xff]   ;;  %v4948_v2 = vld [vmem:[%s6449_s1 + $0x158] sm:$0xff]   ;;  %v4952_v6 = vld [vmem:[%s6449_s1 + $0x150] sm:$0xff]  }
  0x12   :  { %4443 = vmatprep.subr.bf16.mxu1 %v4916_v17  ;;  %v755_v46 = vcombine.high %v5409_v43, %v5409_v43  ;;  %v776_v48 = vrot.slane %v754_v44, %v5405_v41  ;;  %v784_v51 = vcombine.high %v762_v45, %v762_v45  ;;  %v4949_v3 = vld [vmem:[%s6449_s1 + $0x1d8] sm:$0xff]   ;;  %v4953_v7 = vld [vmem:[%s6449_s1 + $0x1d0] sm:$0xff]   ;;  %v4956_v10 = vld [vmem:[%s6449_s1 + $0x148] sm:$0xff]  }
  0x13   :  { %v4950_v4 = vld [vmem:[%s6449_s1 + $0x118] sm:$0xff]   ;;  %v4954_v8 = vld [vmem:[%s6449_s1 + $0x110] sm:$0xff]   ;;  %v4957_v11 = vld [vmem:[%s6449_s1 + $0x1c8] sm:$0xff]  }
  0x14   :  { %4422 = vmatpush3.bf16.msra.mxu0 %v4917_v18  ;;  %v783_v50 = vrot.slane %v755_v46, %v5405_v41  ;;  %3196 = vmatprep.mubr.bf16.mxu0 %v776_v48  ;;  %v786_v53 = vcombine.high %v776_v48, %v776_v48  ;;  %v4951_v5 = vld [vmem:[%s6449_s1 + $0x198] sm:$0xff]   ;;  %v4955_v9 = vld [vmem:[%s6449_s1 + $0x190] sm:$0xff]   ;;  %v4958_v12 = vld [vmem:[%s6449_s1 + $0x108] sm:$0xff]   ;;  %v769_v18 = vrot.slane %v5409_v43, %v5405_v41 }
  0x15   :  { %4444 = vmatpush3.bf16.msra.mxu1 %v4918_v19  ;;  %4423 = vmatprep.subr.bf16.mxu0 %v4919_v20  ;;  %v4959_v13 = vld [vmem:[%s6449_s1 + $0x188] sm:$0xff]   ;;  %v4960_v14 = vld [vmem:[%s6449_s1 + $0x140] sm:$0xff]   ;;  %v4964_v19 = vld [vmem:[%s6449_s1 + $0x278] sm:$0xff]  }
  0x16   :  { %4445 = vmatprep.subr.bf16.mxu1 %v4920_v21  ;;  %v787_v56 = vcombine.high %v783_v50, %v783_v50  ;;  %3236 = vmatprep.mubr.bf16.mxu1 %v786_v53  ;;  %v4961_v15 = vld [vmem:[%s6449_s1 + $0x1c0] sm:$0xff]   ;;  %v4965_v20 = vld [vmem:[%s6449_s1 + $0x2f8] sm:$0xff]   ;;  %v4972_v28 = vld [vmem:[%s6449_s1 + $0x268] sm:$0xff]  }
  0x17   :  { %v4962_v16 = vld [vmem:[%s6449_s1 + $0x100] sm:$0xff]   ;;  %v4966_v21 = vld [vmem:[%s6449_s1 + $0x238] sm:$0xff]   ;;  %v4984_v40 = vld [vmem:[%s6449_s1 + $0x250] sm:$0xff]  }
  0x18   :  { %4424 = vmatpush3.bf16.msra.mxu0 %v4921_v22  ;;  %v4963_v17 = vld [vmem:[%s6449_s1 + $0x180] sm:$0xff]   ;;  %v4967_v22 = vld [vmem:[%s6449_s1 + $0x2b8] sm:$0xff]   ;;  %v4985_v42 = vld [vmem:[%s6449_s1 + $0x2d0] sm:$0xff]  }
  0x19   :  { %4446 = vmatpush3.bf16.msra.mxu1 %v4922_v23  ;;  %4425 = vmatprep.subr.bf16.mxu0 %v4923_v24  ;;  %v785_v23 = vcombine.high %v769_v18, %v769_v18  ;;  %v4968_v24 = vld [vmem:[%s6449_s1 + $0x270] sm:$0xff]   ;;  %v4977_v33 = vld [vmem:[%s6449_s1 + $0x2e0] sm:$0xff]   ;;  %v4980_v36 = vld [vmem:[%s6449_s1 + $0x258] sm:$0xff]  }
  0x1a   :  { %4447 = vmatprep.subr.bf16.mxu1 %v4924_v25  ;;  %v4969_v25 = vld [vmem:[%s6449_s1 + $0x2f0] sm:$0xff]   ;;  %v4978_v34 = vld [vmem:[%s6449_s1 + $0x220] sm:$0xff]   ;;  %v4981_v37 = vld [vmem:[%s6449_s1 + $0x2d8] sm:$0xff]  }
  0x1b   :  { %v4983_v39 = vld [vmem:[%s6449_s1 + $0x298] sm:$0xff]   ;;  %v4986_v43 = vld [vmem:[%s6449_s1 + $0x210] sm:$0xff]   ;;  %v17_v46 = vld [vmem:[%s6448_s0 + $0x8] sm:$0xff] }
  0x1c   :  { %4426 = vmatpush3.bf16.msra.mxu0 %v4925_v26  ;;  %v4970_v26 = vld [vmem:[%s6449_s1 + $0x230] sm:$0xff]   ;;  %v795_v48 = vrot.slane %v17_v46, %v5405_v41 }
  0x1d   :  { %4448 = vmatpush3.bf16.msra.mxu1 %v4926_v27  ;;  %4427 = vmatprep.subr.bf16.mxu0 %v4927_v29  ;;  %v4971_v27 = vld [vmem:[%s6449_s1 + $0x2b0] sm:$0xff]   ;;  %v4973_v29 = vld [vmem:[%s6449_s1 + $0x2e8] sm:$0xff]  }
  0x1e   :  { %4449 = vmatprep.subr.bf16.mxu1 %v4928_v30  ;;  %v4974_v30 = vld [vmem:[%s6449_s1 + $0x228] sm:$0xff]   ;;  %v4987_v44 = vld [vmem:[%s6449_s1 + $0x290] sm:$0xff]  }
  0x20   :  { %4428 = vmatpush3.bf16.msra.mxu0 %v4929_v31  ;;  %v4975_v31 = vld [vmem:[%s6449_s1 + $0x2a8] sm:$0xff]  }
  0x21   :  { %4450 = vmatpush3.bf16.msra.mxu1 %v4930_v32  ;;  %4457 = vmatprep.subr.bf16.mxu0 %v4932_v35  ;;  %v4976_v32 = vld [vmem:[%s6449_s1 + $0x260] sm:$0xff]  }
  0x22   :  { %4479 = vmatprep.subr.bf16.mxu1 %v4933_v38  ;;  %v4979_v35 = vld [vmem:[%s6449_s1 + $0x2a0] sm:$0xff]   ;;  %v4982_v38 = vld [vmem:[%s6449_s1 + $0x218] sm:$0xff]  }
  0x23   :  { %3197 = vmatmul.mubr.bf16.vlgmr.msra.gmra.mxu0 %v762_v45  ;;  %v4988_v45 = vld [vmem:[%s6449_s1 + $0x248] sm:$0xff]  }
  0x24   :  { %4458 = vmatpush3.bf16.msra.mxu0 %v4934_v47  ;;  %3237 = vmatmul.mubr.bf16.vlgmr.msra.gmra.mxu1 %v784_v51  ;;  %v4989_v47 = vld [vmem:[%s6449_s1 + $0x2c8] sm:$0xff]  }
  0x25   :  { %4459 = vmatprep.subr.bf16.mxu0 %v4936_v52  ;;  %4480 = vmatpush3.bf16.msra.mxu1 %v4935_v49  ;;  %v788_v49 = vcombine.high %v17_v46, %v17_v46  ;;  %v4991_v51 = vld [vmem:[%s6449_s1 + $0x288] sm:$0xff]   ;;  %v803_v52 = vcombine.high %v795_v48, %v795_v48 }
  0x26   :  { %3276 = vmatprep.mubr.bf16.mxu0 %v783_v50  ;;  %4481 = vmatprep.subr.bf16.mxu1 %v4937_v54  ;;  %v4990_v50 = vld [vmem:[%s6449_s1 + $0x208] sm:$0xff]   ;;  %v4992_v54 = vld [vmem:[%s6449_s1 + $0x240] sm:$0xff]  }
  0x27   :  { %3316 = vmatprep.mubr.bf16.mxu1 %v787_v56  ;;  %v5597_v53 = vrot.slane %v788_v49, %v5405_v41  ;;  %v825_v56 = vrot.slane %v803_v52, %v5405_v41  ;;  %v5039_v46 = vld [vmem:[%s6449_s1 + $0x428] sm:$0xff]   ;;  %v5042_v49 = vld [vmem:[%s6449_s1 + $0x4e0] sm:$0xff]   ;;  %v5045_v52 = vld [vmem:[%s6449_s1 + $0x458] sm:$0xff]  }
  0x28   :  { %4460 = vmatpush3.bf16.msra.mxu0 %v4938_v55  ;;  %v4993_v55 = vld [vmem:[%s6449_s1 + $0x2c0] sm:$0xff]  }
  0x29   :  { %4461 = vmatprep.subr.bf16.mxu0 %v4940_v58  ;;  %4482 = vmatpush3.bf16.msra.mxu1 %v4939_v57  ;;  %v804_v57 = vcombine.high %v5597_v53, %v5597_v53  ;;  %v4994_v58 = vld [vmem:[%s6449_s1 + $0x200] sm:$0xff]  }
  0x2a   :  { %4483 = vmatprep.subr.bf16.mxu1 %v4941_v59  ;;  %v4995_v59 = vld [vmem:[%s6449_s1 + $0x280] sm:$0xff]  }
  0x2c   :  { %4462 = vmatpush3.bf16.msra.mxu0 %v4942_v60  ;;  %v835_v60 = vcombine.high %v825_v56, %v825_v56 }
  0x2d   :  { %4463 = vmatprep.subr.bf16.mxu0 %v4944_v62  ;;  %4484 = vmatpush3.bf16.msra.mxu1 %v4943_v61  ;;  %v811_v61 = vrot.slane %v795_v48, %v5405_v41  ;;  %v4996_v62 = vld [vmem:[%s6449_s1 + $0x378] sm:$0xff]   ;;  %v5041_v48 = vld [vmem:[%s6449_s1 + $0x460] sm:$0xff]  }
  0x2e   :  { %4485 = vmatprep.subr.bf16.mxu1 %v4945_v63  ;;  %v4997_v63 = vld [vmem:[%s6449_s1 + $0x3f8] sm:$0xff]  }
  0x30   :  { %4464 = vmatpush3.bf16.msra.mxu0 %v4946_v0  ;;  %v832_v0 = vrot.slane %v804_v57, %v5405_v41  ;;  %v5050_v57 = vld [vmem:[%s6449_s1 + $0x4d0] sm:$0xff]  }
  0x31   :  { %4465 = vmatprep.subr.bf16.mxu0 %v4948_v2  ;;  %4486 = vmatpush3.bf16.msra.mxu1 %v4947_v1  ;;  %v4998_v1 = vld [vmem:[%s6449_s1 + $0x338] sm:$0xff]  }
  0x32   :  { %4487 = vmatprep.subr.bf16.mxu1 %v4949_v3  ;;  %v4999_v2 = vld [vmem:[%s6449_s1 + $0x3b8] sm:$0xff]   ;;  %v833_v3 = vcombine.high %v811_v61, %v811_v61 }
  0x34   :  { %4466 = vmatpush3.bf16.msra.mxu0 %v4950_v4  ;;  %v5000_v4 = vld [vmem:[%s6449_s1 + $0x370] sm:$0xff]  }
  0x35   :  { %4467 = vmatprep.subr.bf16.mxu0 %v4952_v6  ;;  %4488 = vmatpush3.bf16.msra.mxu1 %v4951_v5  ;;  %v5001_v5 = vld [vmem:[%s6449_s1 + $0x3f0] sm:$0xff]   ;;  %v836_v6 = vcombine.high %v832_v0, %v832_v0 }
  0x36   :  { %4489 = vmatprep.subr.bf16.mxu1 %v4953_v7  ;;  %v5002_v7 = vld [vmem:[%s6449_s1 + $0x330] sm:$0xff]  }
  0x38   :  { %4468 = vmatpush3.bf16.msra.mxu0 %v4954_v8  ;;  %v5003_v8 = vld [vmem:[%s6449_s1 + $0x3b0] sm:$0xff]  }
  0x39   :  { %4469 = vmatprep.subr.bf16.mxu0 %v4956_v10  ;;  %4490 = vmatpush3.bf16.msra.mxu1 %v4955_v9  ;;  %v5004_v9 = vld [vmem:[%s6449_s1 + $0x368] sm:$0xff]  }
  0x3a   :  { %4491 = vmatprep.subr.bf16.mxu1 %v4957_v11  ;;  %v5005_v10 = vld [vmem:[%s6449_s1 + $0x3e8] sm:$0xff]  }
  0x3b   :  { %v5006_v11 = vld [vmem:[%s6449_s1 + $0x328] sm:$0xff]  }
  0x3c   :  { %4470 = vmatpush3.bf16.msra.mxu0 %v4958_v12  ;;  %v5007_v12 = vld [vmem:[%s6449_s1 + $0x3a8] sm:$0xff]  }
  0x3d   :  { %4471 = vmatprep.subr.bf16.mxu0 %v4960_v14  ;;  %4492 = vmatpush3.bf16.msra.mxu1 %v4959_v13  ;;  %v5008_v13 = vld [vmem:[%s6449_s1 + $0x360] sm:$0xff]  }
  0x3e   :  { %4493 = vmatprep.subr.bf16.mxu1 %v4961_v15  ;;  %v5009_v14 = vld [vmem:[%s6449_s1 + $0x3e0] sm:$0xff]  }
  0x3f   :  { %v5010_v15 = vld [vmem:[%s6449_s1 + $0x320] sm:$0xff]  }
  0x40   :  { %4472 = vmatpush3.bf16.msra.mxu0 %v4962_v16  ;;  %v5011_v16 = vld [vmem:[%s6449_s1 + $0x3a0] sm:$0xff]  }
  0x41   :  { %4501 = vmatprep.subr.bf16.mxu0 %v4964_v19  ;;  %4494 = vmatpush3.bf16.msra.mxu1 %v4963_v17  ;;  %v5012_v17 = vld [vmem:[%s6449_s1 + $0x358] sm:$0xff]  }
  0x42   :  { %4523 = vmatprep.subr.bf16.mxu1 %v4965_v20  ;;  %v5014_v19 = vld [vmem:[%s6449_s1 + $0x318] sm:$0xff]  }
  0x43   :  { %3277 = vmatmul.mubr.bf16.vlgmr.msra.gmra.mxu0 %v769_v18  ;;  %v5013_v18 = vld [vmem:[%s6449_s1 + $0x3d8] sm:$0xff]  }
  0x44   :  { %4502 = vmatpush3.bf16.msra.mxu0 %v4966_v21  ;;  %3317 = vmatmul.mubr.bf16.vlgmr.msra.gmra.mxu1 %v785_v23  ;;  %v5015_v20 = vld [vmem:[%s6449_s1 + $0x398] sm:$0xff]   ;;  %v5016_v21 = vld [vmem:[%s6449_s1 + $0x350] sm:$0xff]  }
  0x45   :  { %4503 = vmatprep.subr.bf16.mxu0 %v4968_v24  ;;  %4524 = vmatpush3.bf16.msra.mxu1 %v4967_v22  ;;  %v5017_v22 = vld [vmem:[%s6449_s1 + $0x3d0] sm:$0xff]  }
  0x46   :  { %4525 = vmatprep.subr.bf16.mxu1 %v4969_v25  ;;  %3356 = vmatprep.mubr.bf16.mxu0 %v825_v56  ;;  %v5018_v23 = vld [vmem:[%s6449_s1 + $0x310] sm:$0xff]   ;;  %v5020_v25 = vld [vmem:[%s6449_s1 + $0x348] sm:$0xff]  }
  0x47   :  { %3396 = vmatprep.mubr.bf16.mxu1 %v835_v60  ;;  %v5019_v24 = vld [vmem:[%s6449_s1 + $0x390] sm:$0xff]   ;;  %v5053_v60 = vld [vmem:[%s6449_s1 + $0x448] sm:$0xff]  }
  0x48   :  { %4504 = vmatpush3.bf16.msra.mxu0 %v4970_v26  ;;  %v5021_v26 = vld [vmem:[%s6449_s1 + $0x3c8] sm:$0xff]   ;;  %v5049_v56 = vld [vmem:[%s6449_s1 + $0x450] sm:$0xff]  }
  0x49   :  { %4505 = vmatprep.subr.bf16.mxu0 %v4972_v28  ;;  %4526 = vmatpush3.bf16.msra.mxu1 %v4971_v27  ;;  %v5022_v27 = vld [vmem:[%s6449_s1 + $0x308] sm:$0xff]  }
  0x4a   :  { %4527 = vmatprep.subr.bf16.mxu1 %v4973_v29  ;;  %v5023_v28 = vld [vmem:[%s6449_s1 + $0x388] sm:$0xff]   ;;  %v5024_v29 = vld [vmem:[%s6449_s1 + $0x340] sm:$0xff]  }
  0x4c   :  { %4506 = vmatpush3.bf16.msra.mxu0 %v4974_v30  ;;  %v5025_v30 = vld [vmem:[%s6449_s1 + $0x3c0] sm:$0xff]  }
  0x4d   :  { %4507 = vmatprep.subr.bf16.mxu0 %v4976_v32  ;;  %4528 = vmatpush3.bf16.msra.mxu1 %v4975_v31  ;;  %v5026_v31 = vld [vmem:[%s6449_s1 + $0x300] sm:$0xff]  }
  0x4e   :  { %4529 = vmatprep.subr.bf16.mxu1 %v4977_v33  ;;  %v5027_v32 = vld [vmem:[%s6449_s1 + $0x380] sm:$0xff]   ;;  %v818_v33 = vrot.slane %v5597_v53, %v5405_v41  ;;  %v5046_v53 = vld [vmem:[%s6449_s1 + $0x4d8] sm:$0xff]  }
  0x50   :  { %4508 = vmatpush3.bf16.msra.mxu0 %v4978_v34  ;;  %v5029_v34 = vld [vmem:[%s6449_s1 + $0x478] sm:$0xff]  }
  0x51   :  { %4509 = vmatprep.subr.bf16.mxu0 %v4980_v36  ;;  %4530 = vmatpush3.bf16.msra.mxu1 %v4979_v35  ;;  %v5030_v35 = vld [vmem:[%s6449_s1 + $0x4f8] sm:$0xff]  }
  0x52   :  { %4531 = vmatprep.subr.bf16.mxu1 %v4981_v37  ;;  %v5031_v36 = vld [vmem:[%s6449_s1 + $0x438] sm:$0xff]  }
  0x53   :  { %v5032_v37 = vld [vmem:[%s6449_s1 + $0x4b8] sm:$0xff]  }
  0x54   :  { %4510 = vmatpush3.bf16.msra.mxu0 %v4982_v38  ;;  %v834_v38 = vcombine.high %v818_v33, %v818_v33 }
  0x55   :  { %4511 = vmatprep.subr.bf16.mxu0 %v4984_v40  ;;  %4532 = vmatpush3.bf16.msra.mxu1 %v4983_v39  ;;  %v5033_v39 = vld [vmem:[%s6449_s1 + $0x470] sm:$0xff]  }
  0x56   :  { %4533 = vmatprep.subr.bf16.mxu1 %v4985_v42  ;;  %v5034_v40 = vld [vmem:[%s6449_s1 + $0x4f0] sm:$0xff]  }
  0x57   :  { %v5035_v42 = vld [vmem:[%s6449_s1 + $0x430] sm:$0xff]  }
  0x58   :  { %4512 = vmatpush3.bf16.msra.mxu0 %v4986_v43  ;;  %v5036_v43 = vld [vmem:[%s6449_s1 + $0x4b0] sm:$0xff]  }
  0x59   :  { %4513 = vmatprep.subr.bf16.mxu0 %v4988_v45  ;;  %4534 = vmatpush3.bf16.msra.mxu1 %v4987_v44  ;;  %v5037_v44 = vld [vmem:[%s6449_s1 + $0x468] sm:$0xff]  }
  0x5a   :  { %4535 = vmatprep.subr.bf16.mxu1 %v4989_v47  ;;  %v5038_v45 = vld [vmem:[%s6449_s1 + $0x4e8] sm:$0xff]  }
  0x5b   :  { %v5040_v47 = vld [vmem:[%s6449_s1 + $0x4a8] sm:$0xff]  }
  0x5c   :  { %4514 = vmatpush3.bf16.msra.mxu0 %v4990_v50  ;;  %v5043_v50 = vld [vmem:[%s6449_s1 + $0x420] sm:$0xff]  }
  0x5d   :  { %4515 = vmatprep.subr.bf16.mxu0 %v4992_v54  ;;  %4536 = vmatpush3.bf16.msra.mxu1 %v4991_v51  ;;  %v5044_v51 = vld [vmem:[%s6449_s1 + $0x4a0] sm:$0xff]   ;;  %v5047_v54 = vld [vmem:[%s6449_s1 + $0x418] sm:$0xff]  }
  0x5e   :  { %4537 = vmatprep.subr.bf16.mxu1 %v4993_v55  ;;  %v5048_v55 = vld [vmem:[%s6449_s1 + $0x498] sm:$0xff]  }
  0x60   :  { %4516 = vmatpush3.bf16.msra.mxu0 %v4994_v58  ;;  %v5051_v58 = vld [vmem:[%s6449_s1 + $0x410] sm:$0xff]  }
  0x61   :  { %4545 = vmatprep.subr.bf16.mxu0 %v4996_v62  ;;  %4538 = vmatpush3.bf16.msra.mxu1 %v4995_v59  ;;  %v5052_v59 = vld [vmem:[%s6449_s1 + $0x490] sm:$0xff]   ;;  %v5054_v62 = vld [vmem:[%s6449_s1 + $0x4c8] sm:$0xff]  }
  0x62   :  { %4567 = vmatprep.subr.bf16.mxu1 %v4997_v63 }
  0x63   :  { %3357 = vmatmul.mubr.bf16.vlgmr.msra.gmra.mxu0 %v811_v61  ;;  %v18_v61 = vld [vmem:[%s6448_s0 + $0x10] sm:$0xff] }
  0x64   :  { %4546 = vmatpush3.bf16.msra.mxu0 %v4998_v1  ;;  %3436 = vmatprep.mubr.bf16.mxu0 %v832_v0  ;;  %v844_v63 = vrot.slane %v18_v61, %v5405_v41  ;;  %v837_v0 = vcombine.high %v18_v61, %v18_v61  ;;  %v5055_v1 = vld [vmem:[%s6449_s1 + $0x408] sm:$0xff]  }
  0x65   :  { %3397 = vmatmul.mubr.bf16.vlgmr.msra.gmra.mxu1 %v833_v3  ;;  %4547 = vmatprep.subr.bf16.mxu0 %v5000_v4  ;;  %v5104_v61 = vld [vmem:[%s6449_s1 + $0x628] sm:$0xff]  }
  0x66   :  { %4568 = vmatpush3.bf16.msra.mxu1 %v4999_v2  ;;  %3476 = vmatprep.mubr.bf16.mxu1 %v836_v6  ;;  %v5056_v2 = vld [vmem:[%s6449_s1 + $0x488] sm:$0xff]   ;;  %v852_v3 = vcombine.high %v844_v63, %v844_v63  ;;  %v5803_v4 = vrot.slane %v837_v0, %v5405_v41  ;;  %v5058_v6 = vld [vmem:[%s6449_s1 + $0x4c0] sm:$0xff]  }
  0x67   :  { %4569 = vmatprep.subr.bf16.mxu1 %v5001_v5  ;;  %v5057_v5 = vld [vmem:[%s6449_s1 + $0x440] sm:$0xff]  }
  0x68   :  { %4548 = vmatpush3.bf16.msra.mxu0 %v5002_v7  ;;  %v874_v7 = vrot.slane %v852_v3, %v5405_v41  ;;  %v5107_v0 = vld [vmem:[%s6449_s1 + $0x6e0] sm:$0xff]   ;;  %v5110_v3 = vld [vmem:[%s6449_s1 + $0x658] sm:$0xff]  }
  0x69   :  { %4549 = vmatprep.subr.bf16.mxu0 %v5004_v9  ;;  %v5059_v9 = vld [vmem:[%s6449_s1 + $0x400] sm:$0xff]  }
  0x6a   :  { %4570 = vmatpush3.bf16.msra.mxu1 %v5003_v8  ;;  %v853_v8 = vcombine.high %v5803_v4, %v5803_v4 }
  0x6b   :  { %4571 = vmatprep.subr.bf16.mxu1 %v5005_v10  ;;  %v5060_v10 = vld [vmem:[%s6449_s1 + $0x480] sm:$0xff]  }
  0x6c   :  { %4550 = vmatpush3.bf16.msra.mxu0 %v5006_v11  ;;  %v884_v11 = vcombine.high %v874_v7, %v874_v7 }
  0x6d   :  { %4551 = vmatprep.subr.bf16.mxu0 %v5008_v13  ;;  %v5061_v13 = vld [vmem:[%s6449_s1 + $0x578] sm:$0xff]  }
  0x6e   :  { %4572 = vmatpush3.bf16.msra.mxu1 %v5007_v12  ;;  %v860_v12 = vrot.slane %v844_v63, %v5405_v41  ;;  %v5106_v63 = vld [vmem:[%s6449_s1 + $0x660] sm:$0xff]  }
  0x6f   :  { %4573 = vmatprep.subr.bf16.mxu1 %v5009_v14  ;;  %v5062_v14 = vld [vmem:[%s6449_s1 + $0x5f8] sm:$0xff]  }
  0x70   :  { %4552 = vmatpush3.bf16.msra.mxu0 %v5010_v15  ;;  %v881_v15 = vrot.slane %v853_v8, %v5405_v41  ;;  %v5115_v8 = vld [vmem:[%s6449_s1 + $0x6d0] sm:$0xff]  }
  0x71   :  { %4553 = vmatprep.subr.bf16.mxu0 %v5012_v17  ;;  %v5064_v17 = vld [vmem:[%s6449_s1 + $0x5b8] sm:$0xff]  }
  0x72   :  { %4574 = vmatpush3.bf16.msra.mxu1 %v5011_v16  ;;  %v5063_v16 = vld [vmem:[%s6449_s1 + $0x538] sm:$0xff]  }
  0x73   :  { %4575 = vmatprep.subr.bf16.mxu1 %v5013_v18  ;;  %v882_v18 = vcombine.high %v860_v12, %v860_v12 }
  0x74   :  { %4554 = vmatpush3.bf16.msra.mxu0 %v5014_v19  ;;  %v5065_v19 = vld [vmem:[%s6449_s1 + $0x570] sm:$0xff]  }
  0x75   :  { %4555 = vmatprep.subr.bf16.mxu0 %v5016_v21  ;;  %v885_v21 = vcombine.high %v881_v15, %v881_v15 }
  0x76   :  { %4576 = vmatpush3.bf16.msra.mxu1 %v5015_v20  ;;  %v5066_v20 = vld [vmem:[%s6449_s1 + $0x5f0] sm:$0xff]  }
  0x77   :  { %4577 = vmatprep.subr.bf16.mxu1 %v5017_v22  ;;  %v5067_v22 = vld [vmem:[%s6449_s1 + $0x530] sm:$0xff]  }
  0x78   :  { %4556 = vmatpush3.bf16.msra.mxu0 %v5018_v23  ;;  %v5068_v23 = vld [vmem:[%s6449_s1 + $0x5b0] sm:$0xff]  }
  0x79   :  { %4557 = vmatprep.subr.bf16.mxu0 %v5020_v25  ;;  %v5070_v25 = vld [vmem:[%s6449_s1 + $0x5e8] sm:$0xff]  }
  0x7a   :  { %4578 = vmatpush3.bf16.msra.mxu1 %v5019_v24  ;;  %v5069_v24 = vld [vmem:[%s6449_s1 + $0x568] sm:$0xff]  }
  0x7b   :  { %4579 = vmatprep.subr.bf16.mxu1 %v5021_v26  ;;  %v5071_v26 = vld [vmem:[%s6449_s1 + $0x528] sm:$0xff]  }
  0x7c   :  { %4558 = vmatpush3.bf16.msra.mxu0 %v5022_v27  ;;  %v5072_v27 = vld [vmem:[%s6449_s1 + $0x5a8] sm:$0xff]  }
  0x7d   :  { %4559 = vmatprep.subr.bf16.mxu0 %v5024_v29  ;;  %v5074_v29 = vld [vmem:[%s6449_s1 + $0x5e0] sm:$0xff]  }
  0x7e   :  { %4580 = vmatpush3.bf16.msra.mxu1 %v5023_v28  ;;  %v5073_v28 = vld [vmem:[%s6449_s1 + $0x560] sm:$0xff]  }
  0x7f   :  { %4581 = vmatprep.subr.bf16.mxu1 %v5025_v30  ;;  %v5075_v30 = vld [vmem:[%s6449_s1 + $0x520] sm:$0xff]  }
  0x80   :  { %4560 = vmatpush3.bf16.msra.mxu0 %v5026_v31  ;;  %v5076_v31 = vld [vmem:[%s6449_s1 + $0x5a0] sm:$0xff]  }
  0x81   :  { %4589 = vmatprep.subr.bf16.mxu0 %v5029_v34  ;;  %v5079_v34 = vld [vmem:[%s6449_s1 + $0x518] sm:$0xff]  }
  0x82   :  { %4582 = vmatpush3.bf16.msra.mxu1 %v5027_v32  ;;  %v5077_v32 = vld [vmem:[%s6449_s1 + $0x558] sm:$0xff]  }
  0x83   :  { %3437 = vmatmul.mubr.bf16.vlgmr.msra.gmra.mxu0 %v818_v33  ;;  %4611 = vmatprep.subr.bf16.mxu1 %v5030_v35  ;;  %v5078_v33 = vld [vmem:[%s6449_s1 + $0x5d8] sm:$0xff]  }
  0x84   :  { %4590 = vmatpush3.bf16.msra.mxu0 %v5031_v36  ;;  %3516 = vmatprep.mubr.bf16.mxu0 %v874_v7  ;;  %v5080_v35 = vld [vmem:[%s6449_s1 + $0x598] sm:$0xff]   ;;  %v5081_v36 = vld [vmem:[%s6449_s1 + $0x550] sm:$0xff]  }
  0x85   :  { %3477 = vmatmul.mubr.bf16.vlgmr.msra.gmra.mxu1 %v834_v38  ;;  %4591 = vmatprep.subr.bf16.mxu0 %v5033_v39  ;;  %v5083_v38 = vld [vmem:[%s6449_s1 + $0x510] sm:$0xff]  }
  0x86   :  { %4612 = vmatpush3.bf16.msra.mxu1 %v5032_v37  ;;  %3556 = vmatprep.mubr.bf16.mxu1 %v884_v11  ;;  %v5082_v37 = vld [vmem:[%s6449_s1 + $0x5d0] sm:$0xff]   ;;  %v5118_v11 = vld [vmem:[%s6449_s1 + $0x648] sm:$0xff]  }
  0x87   :  { %4613 = vmatprep.subr.bf16.mxu1 %v5034_v40  ;;  %v5084_v39 = vld [vmem:[%s6449_s1 + $0x590] sm:$0xff]   ;;  %v5085_v40 = vld [vmem:[%s6449_s1 + $0x548] sm:$0xff]  }
  0x88   :  { %4592 = vmatpush3.bf16.msra.mxu0 %v5035_v42  ;;  %v5086_v42 = vld [vmem:[%s6449_s1 + $0x5c8] sm:$0xff]   ;;  %v5114_v7 = vld [vmem:[%s6449_s1 + $0x650] sm:$0xff]  }
  0x89   :  { %4593 = vmatprep.subr.bf16.mxu0 %v5037_v44  ;;  %v5088_v44 = vld [vmem:[%s6449_s1 + $0x588] sm:$0xff]  }
  0x8a   :  { %4614 = vmatpush3.bf16.msra.mxu1 %v5036_v43  ;;  %v5087_v43 = vld [vmem:[%s6449_s1 + $0x508] sm:$0xff]  }
  0x8b   :  { %4615 = vmatprep.subr.bf16.mxu1 %v5038_v45  ;;  %v5089_v45 = vld [vmem:[%s6449_s1 + $0x540] sm:$0xff]  }
  0x8c   :  { %4594 = vmatpush3.bf16.msra.mxu0 %v5039_v46  ;;  %v5090_v46 = vld [vmem:[%s6449_s1 + $0x5c0] sm:$0xff]  }
  0x8d   :  { %4595 = vmatprep.subr.bf16.mxu0 %v5041_v48  ;;  %v5092_v48 = vld [vmem:[%s6449_s1 + $0x580] sm:$0xff]  }
  0x8e   :  { %4616 = vmatpush3.bf16.msra.mxu1 %v5040_v47  ;;  %v5091_v47 = vld [vmem:[%s6449_s1 + $0x500] sm:$0xff]  }
  0x8f   :  { %4617 = vmatprep.subr.bf16.mxu1 %v5042_v49  ;;  %v867_v49 = vrot.slane %v5803_v4, %v5405_v41  ;;  %v5111_v4 = vld [vmem:[%s6449_s1 + $0x6d8] sm:$0xff]  }
  0x90   :  { %4596 = vmatpush3.bf16.msra.mxu0 %v5043_v50  ;;  %v5094_v50 = vld [vmem:[%s6449_s1 + $0x678] sm:$0xff]  }
  0x91   :  { %4597 = vmatprep.subr.bf16.mxu0 %v5045_v52  ;;  %v5096_v52 = vld [vmem:[%s6449_s1 + $0x638] sm:$0xff]  }
  0x92   :  { %4618 = vmatpush3.bf16.msra.mxu1 %v5044_v51  ;;  %v5095_v51 = vld [vmem:[%s6449_s1 + $0x6f8] sm:$0xff]  }
  0x93   :  { %4619 = vmatprep.subr.bf16.mxu1 %v5046_v53  ;;  %v5097_v53 = vld [vmem:[%s6449_s1 + $0x6b8] sm:$0xff]  }
  0x94   :  { %4598 = vmatpush3.bf16.msra.mxu0 %v5047_v54  ;;  %v883_v54 = vcombine.high %v867_v49, %v867_v49 }
  0x95   :  { %4599 = vmatprep.subr.bf16.mxu0 %v5049_v56  ;;  %v5099_v56 = vld [vmem:[%s6449_s1 + $0x6f0] sm:$0xff]  }
  0x96   :  { %4620 = vmatpush3.bf16.msra.mxu1 %v5048_v55  ;;  %v5098_v55 = vld [vmem:[%s6449_s1 + $0x670] sm:$0xff]  }
  0x97   :  { %4621 = vmatprep.subr.bf16.mxu1 %v5050_v57  ;;  %v5100_v57 = vld [vmem:[%s6449_s1 + $0x630] sm:$0xff]  }
  0x98   :  { %4600 = vmatpush3.bf16.msra.mxu0 %v5051_v58  ;;  %v5101_v58 = vld [vmem:[%s6449_s1 + $0x6b0] sm:$0xff]  }
  0x99   :  { %4601 = vmatprep.subr.bf16.mxu0 %v5053_v60  ;;  %v5103_v60 = vld [vmem:[%s6449_s1 + $0x6e8] sm:$0xff]  }
  0x9a   :  { %4622 = vmatpush3.bf16.msra.mxu1 %v5052_v59  ;;  %v5102_v59 = vld [vmem:[%s6449_s1 + $0x668] sm:$0xff]  }
  0x9b   :  { %4623 = vmatprep.subr.bf16.mxu1 %v5054_v62  ;;  %v5105_v62 = vld [vmem:[%s6449_s1 + $0x6a8] sm:$0xff]  }
  0x9c   :  { %4602 = vmatpush3.bf16.msra.mxu0 %v5055_v1  ;;  %v5108_v1 = vld [vmem:[%s6449_s1 + $0x620] sm:$0xff]  }
  0x9d   :  { %4603 = vmatprep.subr.bf16.mxu0 %v5057_v5  ;;  %v5112_v5 = vld [vmem:[%s6449_s1 + $0x618] sm:$0xff]  }
  0x9e   :  { %4624 = vmatpush3.bf16.msra.mxu1 %v5056_v2  ;;  %v5109_v2 = vld [vmem:[%s6449_s1 + $0x6a0] sm:$0xff]  }
  0x9f   :  { %4625 = vmatprep.subr.bf16.mxu1 %v5058_v6  ;;  %v5113_v6 = vld [vmem:[%s6449_s1 + $0x698] sm:$0xff]  }
  0xa0   :  { %4604 = vmatpush3.bf16.msra.mxu0 %v5059_v9  ;;  %v5116_v9 = vld [vmem:[%s6449_s1 + $0x610] sm:$0xff]  }
  0xa1   :  { %4633 = vmatprep.subr.bf16.mxu0 %v5061_v13  ;;  %v5119_v13 = vld [vmem:[%s6449_s1 + $0x6c8] sm:$0xff]  }
  0xa2   :  { %4626 = vmatpush3.bf16.msra.mxu1 %v5060_v10  ;;  %v5117_v10 = vld [vmem:[%s6449_s1 + $0x690] sm:$0xff]  }
  0xa3   :  { %3517 = vmatmul.mubr.bf16.vlgmr.msra.gmra.mxu0 %v860_v12  ;;  %4655 = vmatprep.subr.bf16.mxu1 %v5062_v14  ;;  %v19_v12 = vld [vmem:[%s6448_s0 + $0x18] sm:$0xff] }
  0xa4   :  { %4634 = vmatpush3.bf16.msra.mxu0 %v5063_v16  ;;  %3596 = vmatprep.mubr.bf16.mxu0 %v881_v15  ;;  %v893_v14 = vrot.slane %v19_v12, %v5405_v41  ;;  %v886_v15 = vcombine.high %v19_v12, %v19_v12  ;;  %v5120_v16 = vld [vmem:[%s6449_s1 + $0x608] sm:$0xff]   ;;  %v5157_v12 = vld [vmem:[%s6449_s1 + $0x780] sm:$0xff]  }
  0xa5   :  { %3557 = vmatmul.mubr.bf16.vlgmr.msra.gmra.mxu1 %v882_v18  ;;  %4635 = vmatprep.subr.bf16.mxu0 %v5065_v19 }
  0xa6   :  { %4656 = vmatpush3.bf16.msra.mxu1 %v5064_v17  ;;  %3636 = vmatprep.mubr.bf16.mxu1 %v885_v21  ;;  %v5122_v17 = vld [vmem:[%s6449_s1 + $0x640] sm:$0xff]   ;;  %v901_v18 = vcombine.high %v893_v14, %v893_v14  ;;  %v6009_v19 = vrot.slane %v886_v15, %v5405_v41  ;;  %v5160_v15 = vld [vmem:[%s6449_s1 + $0x8f8] sm:$0xff]  }
  0xa7   :  { %4657 = vmatprep.subr.bf16.mxu1 %v5066_v20  ;;  %v5121_v20 = vld [vmem:[%s6449_s1 + $0x688] sm:$0xff]   ;;  %v5123_v21 = vld [vmem:[%s6449_s1 + $0x6c0] sm:$0xff]  }
  0xa8   :  { %4636 = vmatpush3.bf16.msra.mxu0 %v5067_v22  ;;  %v5124_v22 = vld [vmem:[%s6449_s1 + $0x600] sm:$0xff]  }
  0xa9   :  { %4637 = vmatprep.subr.bf16.mxu0 %v5069_v24  ;;  %v902_v24 = vcombine.high %v6009_v19, %v6009_v19 }
  0xaa   :  { %4658 = vmatpush3.bf16.msra.mxu1 %v5068_v23  ;;  %v923_v23 = vrot.slane %v901_v18, %v5405_v41 }
  0xab   :  { %4659 = vmatprep.subr.bf16.mxu1 %v5070_v25  ;;  %v5125_v25 = vld [vmem:[%s6449_s1 + $0x680] sm:$0xff]  }
  0xac   :  { %4638 = vmatpush3.bf16.msra.mxu0 %v5071_v26  ;;  %v933_v26 = vcombine.high %v923_v23, %v923_v23 }
  0xad   :  { %4639 = vmatprep.subr.bf16.mxu0 %v5073_v28  ;;  %v5126_v28 = vld [vmem:[%s6449_s1 + $0x778] sm:$0xff]  }
  0xae   :  { %4660 = vmatpush3.bf16.msra.mxu1 %v5072_v27  ;;  %v909_v27 = vrot.slane %v893_v14, %v5405_v41  ;;  %v5159_v14 = vld [vmem:[%s6449_s1 + $0x878] sm:$0xff]  }
  0xaf   :  { %4661 = vmatprep.subr.bf16.mxu1 %v5074_v29  ;;  %v5127_v29 = vld [vmem:[%s6449_s1 + $0x7f8] sm:$0xff]  }
  0xb0   :  { %4640 = vmatpush3.bf16.msra.mxu0 %v5075_v30  ;;  %v930_v30 = vrot.slane %v902_v24, %v5405_v41 }
  0xb1   :  { %4641 = vmatprep.subr.bf16.mxu0 %v5077_v32  ;;  %v5129_v32 = vld [vmem:[%s6449_s1 + $0x7b8] sm:$0xff]  }
  0xb2   :  { %4662 = vmatpush3.bf16.msra.mxu1 %v5076_v31  ;;  %v5128_v31 = vld [vmem:[%s6449_s1 + $0x738] sm:$0xff]  }
  0xb3   :  { %4663 = vmatprep.subr.bf16.mxu1 %v5078_v33  ;;  %v931_v33 = vcombine.high %v909_v27, %v909_v27 }
  0xb4   :  { %4642 = vmatpush3.bf16.msra.mxu0 %v5079_v34  ;;  %v5130_v34 = vld [vmem:[%s6449_s1 + $0x770] sm:$0xff]  }
  0xb5   :  { %4643 = vmatprep.subr.bf16.mxu0 %v5081_v36  ;;  %v934_v36 = vcombine.high %v930_v30, %v930_v30 }
  0xb6   :  { %4664 = vmatpush3.bf16.msra.mxu1 %v5080_v35  ;;  %v5131_v35 = vld [vmem:[%s6449_s1 + $0x7f0] sm:$0xff]  }
  0xb7   :  { %4665 = vmatprep.subr.bf16.mxu1 %v5082_v37 }
  0xb8   :  { %4644 = vmatpush3.bf16.msra.mxu0 %v5083_v38  ;;  %v4059_v38 = vld [vmem:[%s6450_s2] ss:$0 sm:$0xff] }
  0xb9   :  { %4645 = vmatprep.subr.bf16.mxu0 %v5085_v40  ;;  %v5133_v40 = vld [vmem:[%s6449_s1 + $0x7b0] sm:$0xff]  }
  0xba   :  { %4666 = vmatpush3.bf16.msra.mxu1 %v5084_v39  ;;  %v5132_v39 = vld [vmem:[%s6449_s1 + $0x730] sm:$0xff]  }
  0xbb   :  { %4667 = vmatprep.subr.bf16.mxu1 %v5086_v42 }
  0xbc   :  { %4646 = vmatpush3.bf16.msra.mxu0 %v5087_v43 }
  0xbd   :  { %4647 = vmatprep.subr.bf16.mxu0 %v5089_v45 }
  0xbe   :  { %4668 = vmatpush3.bf16.msra.mxu1 %v5088_v44  ;;  %v5134_v44 = vld [vmem:[%s6449_s1 + $0x768] sm:$0xff]  }
  0xbf   :  { %4669 = vmatprep.subr.bf16.mxu1 %v5090_v46  ;;  %v5135_v46 = vld [vmem:[%s6449_s1 + $0x7e8] sm:$0xff]  }
  0xc0   :  { %4648 = vmatpush3.bf16.msra.mxu0 %v5091_v47 }
  0xc1   :  { %4677 = vmatprep.subr.bf16.mxu0 %v5094_v50 }
  0xc2   :  { %4670 = vmatpush3.bf16.msra.mxu1 %v5092_v48 }
  0xc3   :  { %3597 = vmatmul.mubr.bf16.vlgmr.msra.gmra.mxu0 %v867_v49  ;;  %4699 = vmatprep.subr.bf16.mxu1 %v5095_v51  ;;  %v5136_v49 = vld [vmem:[%s6449_s1 + $0x728] sm:$0xff]  }
  0xc4   :  { %4678 = vmatpush3.bf16.msra.mxu0 %v5096_v52  ;;  %3676 = vmatprep.mubr.bf16.mxu0 %v923_v23  ;;  %v5137_v52 = vld [vmem:[%s6449_s1 + $0x7a8] sm:$0xff]   ;;  %v5166_v23 = vld [vmem:[%s6449_s1 + $0x8b0] sm:$0xff]  }
  0xc5   :  { %3637 = vmatmul.mubr.bf16.vlgmr.msra.gmra.mxu1 %v883_v54  ;;  %4679 = vmatprep.subr.bf16.mxu0 %v5098_v55  ;;  %v5138_v55 = vld [vmem:[%s6449_s1 + $0x760] sm:$0xff]  }
  0xc6   :  { %4700 = vmatpush3.bf16.msra.mxu1 %v5097_v53  ;;  %3716 = vmatprep.mubr.bf16.mxu1 %v933_v26  ;;  %v5167_v26 = vld [vmem:[%s6449_s1 + $0x868] sm:$0xff]  }
  0xc7   :  { %4701 = vmatprep.subr.bf16.mxu1 %v5099_v56 }
  0xc8   :  { %4680 = vmatpush3.bf16.msra.mxu0 %v5100_v57  ;;  %v5139_v57 = vld [vmem:[%s6449_s1 + $0x7e0] sm:$0xff]  }
  0xc9   :  { %4681 = vmatprep.subr.bf16.mxu0 %v5102_v59  ;;  %v5140_v59 = vld [vmem:[%s6449_s1 + $0x720] sm:$0xff]  }
  0xca   :  { %4702 = vmatpush3.bf16.msra.mxu1 %v5101_v58 }
  0xcb   :  { %4703 = vmatprep.subr.bf16.mxu1 %v5103_v60  ;;  %v5141_v60 = vld [vmem:[%s6449_s1 + $0x7a0] sm:$0xff]  }
  0xcc   :  { %4682 = vmatpush3.bf16.msra.mxu0 %v5104_v61  ;;  %v5142_v61 = vld [vmem:[%s6449_s1 + $0x758] sm:$0xff]  }
  0xcd   :  { %4683 = vmatprep.subr.bf16.mxu0 %v5106_v63  ;;  %v5144_v63 = vld [vmem:[%s6449_s1 + $0x718] sm:$0xff]  }
  0xce   :  { %4704 = vmatpush3.bf16.msra.mxu1 %v5105_v62  ;;  %v5143_v62 = vld [vmem:[%s6449_s1 + $0x7d8] sm:$0xff]  }
  0xcf   :  { %4705 = vmatprep.subr.bf16.mxu1 %v5107_v0  ;;  %v5145_v0 = vld [vmem:[%s6449_s1 + $0x798] sm:$0xff]  }
  0xd0   :  { %4684 = vmatpush3.bf16.msra.mxu0 %v5108_v1  ;;  %v5146_v1 = vld [vmem:[%s6449_s1 + $0x750] sm:$0xff]  }
  0xd1   :  { %4685 = vmatprep.subr.bf16.mxu0 %v5110_v3  ;;  %v5148_v3 = vld [vmem:[%s6449_s1 + $0x710] sm:$0xff]  }
  0xd2   :  { %4706 = vmatpush3.bf16.msra.mxu1 %v5109_v2  ;;  %v5147_v2 = vld [vmem:[%s6449_s1 + $0x7d0] sm:$0xff]  }
  0xd3   :  { %4707 = vmatprep.subr.bf16.mxu1 %v5111_v4  ;;  %v5149_v4 = vld [vmem:[%s6449_s1 + $0x790] sm:$0xff]  }
  0xd4   :  { %4686 = vmatpush3.bf16.msra.mxu0 %v5112_v5  ;;  %v5150_v5 = vld [vmem:[%s6449_s1 + $0x748] sm:$0xff]  }
  0xd5   :  { %4687 = vmatprep.subr.bf16.mxu0 %v5114_v7  ;;  %v5152_v7 = vld [vmem:[%s6449_s1 + $0x708] sm:$0xff]  }
  0xd6   :  { %4708 = vmatpush3.bf16.msra.mxu1 %v5113_v6  ;;  %v5151_v6 = vld [vmem:[%s6449_s1 + $0x7c8] sm:$0xff]  }
  0xd7   :  { %4709 = vmatprep.subr.bf16.mxu1 %v5115_v8  ;;  %v5153_v8 = vld [vmem:[%s6449_s1 + $0x788] sm:$0xff]  }
  0xd8   :  { %4688 = vmatpush3.bf16.msra.mxu0 %v5116_v9  ;;  %v5154_v9 = vld [vmem:[%s6449_s1 + $0x740] sm:$0xff]  }
  0xd9   :  { %4689 = vmatprep.subr.bf16.mxu0 %v5118_v11  ;;  %v5156_v11 = vld [vmem:[%s6449_s1 + $0x700] sm:$0xff]  }
  0xda   :  { %4710 = vmatpush3.bf16.msra.mxu1 %v5117_v10  ;;  %v5155_v10 = vld [vmem:[%s6449_s1 + $0x7c0] sm:$0xff]  }
  0xdb   :  { %4711 = vmatprep.subr.bf16.mxu1 %v5119_v13  ;;  %v916_v13 = vrot.slane %v6009_v19, %v5405_v41  ;;  %v5163_v19 = vld [vmem:[%s6449_s1 + $0x870] sm:$0xff]  }
  0xdc   :  { %4690 = vmatpush3.bf16.msra.mxu0 %v5120_v16  ;;  %v5161_v16 = vld [vmem:[%s6449_s1 + $0x838] sm:$0xff]  }
  0xdd   :  { %4691 = vmatprep.subr.bf16.mxu0 %v5122_v17  ;;  %v5162_v17 = vld [vmem:[%s6449_s1 + $0x8b8] sm:$0xff]   ;;  %v932_v18 = vcombine.high %v916_v13, %v916_v13 }
  0xde   :  { %4712 = vmatpush3.bf16.msra.mxu1 %v5121_v20  ;;  %v5164_v20 = vld [vmem:[%s6449_s1 + $0x8f0] sm:$0xff]  }
  0xdf   :  { %4713 = vmatprep.subr.bf16.mxu1 %v5123_v21 }
  0xe0   :  { %4692 = vmatpush3.bf16.msra.mxu0 %v5124_v22  ;;  %v5165_v22 = vld [vmem:[%s6449_s1 + $0x830] sm:$0xff]  }
  0xe1   :  { %4721 = vmatprep.subr.bf16.mxu0 %v5126_v28  ;;  %v5168_v28 = vld [vmem:[%s6449_s1 + $0x8e8] sm:$0xff]  }
  0xe2   :  { %4714 = vmatpush3.bf16.msra.mxu1 %v5125_v25 }
  0xe3   :  { %v4429_v37 = vpop.f32.mrf.mxu0  ;;  %3677 = vmatmul.mubr.bf16.vlgmr.msra.gmra.mxu0 %v909_v27  ;;  %4743 = vmatprep.subr.bf16.mxu1 %v5127_v29 }
  0xe4   :  { %4722 = vmatpush3.bf16.msra.mxu0 %v5128_v31  ;;  %3756 = vmatprep.mubr.bf16.mxu0 %v930_v30  ;;  %v4451_v42 = vpop.f32.mrf.mxu1  ;;  %v5169_v31 = vld [vmem:[%s6449_s1 + $0x828] sm:$0xff]  }
  0xe5   :  { %3717 = vmatmul.mubr.bf16.vlgmr.msra.gmra.mxu1 %v931_v33  ;;  %v4430_v43 = vpop.f32.mrf.mxu0  ;;  %4723 = vmatprep.subr.bf16.mxu0 %v5130_v34  ;;  %v5170_v34 = vld [vmem:[%s6449_s1 + $0x8a8] sm:$0xff]  }
  0xe6   :  { %4744 = vmatpush3.bf16.msra.mxu1 %v5129_v32  ;;  %v4431_v45 = vadd.f32 %v4430_v43, %v4429_v37  ;;  %3796 = vmatprep.mubr.bf16.mxu1 %v934_v36  ;;  %v4452_v47 = vpop.f32.mrf.mxu1  ;;  %v5171_v37 = vld [vmem:[%s6449_s1 + $0x860] sm:$0xff]  }
  0xe7   :  { %v4432_v48 = vpop.f32.mrf.mxu0  ;;  %4745 = vmatprep.subr.bf16.mxu1 %v5131_v35  ;;  %v4453_v51 = vadd.f32 %v4452_v47, %v4451_v42  ;;  %v5173_v42 = vld [vmem:[%s6449_s1 + $0x820] sm:$0xff]   ;;  %v5178_v47 = vld [vmem:[%s6449_s1 + $0x898] sm:$0xff]  }
  0xe8   :  { %v3199_v50 = vadd.f32 %v4431_v45, %v4059_v38  ;;  %4724 = vmatpush3.bf16.msra.mxu0 %v5132_v39  ;;  %v4454_v53 = vpop.f32.mrf.mxu1  ;;  %v5172_v39 = vld [vmem:[%s6449_s1 + $0x8e0] sm:$0xff]   ;;  %v5176_v45 = vld [vmem:[%s6449_s1 + $0x8d8] sm:$0xff]   ;;  %v5179_v48 = vld [vmem:[%s6449_s1 + $0x850] sm:$0xff]  }
  0xe9   :  { %v4433_v54 = vpop.f32.mrf.mxu0  ;;  %4725 = vmatprep.subr.bf16.mxu0 %v5134_v44  ;;  %v5174_v43 = vld [vmem:[%s6449_s1 + $0x8a0] sm:$0xff]   ;;  %v5175_v44 = vld [vmem:[%s6449_s1 + $0x858] sm:$0xff]   ;;  %v5184_v53 = vld [vmem:[%s6449_s1 + $0x8c8] sm:$0xff]  }
  0xea   :  { %v6070_v56 = vadd.f32 %v4453_v51, %v3199_v50  ;;  %4746 = vmatpush3.bf16.msra.mxu1 %v5133_v40  ;;  %v4455_v58 = vpop.f32.mrf.mxu1  ;;  %v5181_v50 = vld [vmem:[%s6449_s1 + $0x810] sm:$0xff]   ;;  %v20_v54 = vld [vmem:[%s6448_s0 + $0x20] sm:$0xff] }
  0xeb   :  { %4747 = vmatprep.subr.bf16.mxu1 %v5135_v46  ;;  %v5177_v46 = vld [vmem:[%s6449_s1 + $0x818] sm:$0xff]   ;;  %v5182_v51 = vld [vmem:[%s6449_s1 + $0x890] sm:$0xff]   ;;  %v5186_v58 = vld [vmem:[%s6449_s1 + $0x888] sm:$0xff]  }
  0xec   :  { %4726 = vmatpush3.bf16.msra.mxu0 %v5136_v49  ;;  %v5180_v49 = vld [vmem:[%s6449_s1 + $0x8d0] sm:$0xff]  }
  0xed   :  { %4727 = vmatprep.subr.bf16.mxu0 %v5138_v55  ;;  %v5185_v55 = vld [vmem:[%s6449_s1 + $0x808] sm:$0xff]  }
  0xee   :  { %4748 = vmatpush3.bf16.msra.mxu1 %v5137_v52  ;;  %v5183_v52 = vld [vmem:[%s6449_s1 + $0x848] sm:$0xff]  }
  0xef   :  { %4749 = vmatprep.subr.bf16.mxu1 %v5139_v57  ;;  %v935_v57 = vcombine.high %v20_v54, %v20_v54 }
  0xf0   :  { %4728 = vmatpush3.bf16.msra.mxu0 %v5140_v59  ;;  %v5187_v59 = vld [vmem:[%s6449_s1 + $0x840] sm:$0xff]  }
  0xf1   :  { %4729 = vmatprep.subr.bf16.mxu0 %v5142_v61  ;;  %v6226_v61 = vrot.slane %v935_v57, %v5405_v41  ;;  %v5227_v57 = vld [vmem:[%s6449_s1 + $0xab8] sm:$0xff]  }
  0xf2   :  { %4750 = vmatpush3.bf16.msra.mxu1 %v5141_v60 }
  0xf3   :  { %4751 = vmatprep.subr.bf16.mxu1 %v5143_v62  ;;  %v5188_v62 = vld [vmem:[%s6449_s1 + $0x8c0] sm:$0xff]  }
  0xf4   :  { %4730 = vmatpush3.bf16.msra.mxu0 %v5144_v63  ;;  %v5189_v63 = vld [vmem:[%s6449_s1 + $0x800] sm:$0xff]  }
  0xf5   :  { %4731 = vmatprep.subr.bf16.mxu0 %v5146_v1  ;;  %v951_v1 = vcombine.high %v6226_v61, %v6226_v61 }
  0xf6   :  { %4752 = vmatpush3.bf16.msra.mxu1 %v5145_v0 }
  0xf7   :  { %4753 = vmatprep.subr.bf16.mxu1 %v5147_v2  ;;  %v5190_v2 = vld [vmem:[%s6449_s1 + $0x880] sm:$0xff]  }
  0xf8   :  { %4732 = vmatpush3.bf16.msra.mxu0 %v5148_v3 }
  0xf9   :  { %4733 = vmatprep.subr.bf16.mxu0 %v5150_v5  ;;  %v5191_v5 = vld [vmem:[%s6449_s1 + $0x978] sm:$0xff]  }
  0xfa   :  { %4754 = vmatpush3.bf16.msra.mxu1 %v5149_v4 }
  0xfb   :  { %4755 = vmatprep.subr.bf16.mxu1 %v5151_v6  ;;  %v5192_v6 = vld [vmem:[%s6449_s1 + $0x9f8] sm:$0xff]  }
  0xfc   :  { %4734 = vmatpush3.bf16.msra.mxu0 %v5152_v7  ;;  %v979_v7 = vrot.slane %v951_v1, %v5405_v41 }
  0xfd   :  { %4735 = vmatprep.subr.bf16.mxu0 %v5154_v9  ;;  %v5194_v9 = vld [vmem:[%s6449_s1 + $0x9b8] sm:$0xff]  }
  0xfe   :  { %4756 = vmatpush3.bf16.msra.mxu1 %v5153_v8  ;;  %v5193_v8 = vld [vmem:[%s6449_s1 + $0x938] sm:$0xff]  }
  0xff   :  { %4757 = vmatprep.subr.bf16.mxu1 %v5155_v10 }
 0x100   :  { %4736 = vmatpush3.bf16.msra.mxu0 %v5156_v11  ;;  %v5195_v11 = vld [vmem:[%s6449_s1 + $0x970] sm:$0xff]  }
 0x101   :  { %4765 = vmatprep.subr.bf16.mxu0 %v5159_v14 }
 0x102   :  { %4758 = vmatpush3.bf16.msra.mxu1 %v5157_v12  ;;  %v5196_v12 = vld [vmem:[%s6449_s1 + $0x9f0] sm:$0xff]  }
 0x103   :  { %v4473_v21 = vpop.f32.mrf.mxu0  ;;  %3757 = vmatmul.mubr.bf16.vlgmr.msra.gmra.mxu0 %v916_v13  ;;  %4787 = vmatprep.subr.bf16.mxu1 %v5160_v15  ;;  %v983_v13 = vcombine.high %v979_v7, %v979_v7  ;;  %v5197_v15 = vld [vmem:[%s6449_s1 + $0x930] sm:$0xff]  }
 0x104   :  { %4766 = vmatpush3.bf16.msra.mxu0 %v5161_v16  ;;  %v4495_v24 = vpop.f32.mrf.mxu1  ;;  %v5198_v16 = vld [vmem:[%s6449_s1 + $0x9b0] sm:$0xff]  }
 0x105   :  { %3797 = vmatmul.mubr.bf16.vlgmr.msra.gmra.mxu1 %v932_v18  ;;  %v4474_v25 = vpop.f32.mrf.mxu0  ;;  %4767 = vmatprep.subr.bf16.mxu0 %v5163_v19  ;;  %v5199_v19 = vld [vmem:[%s6449_s1 + $0x968] sm:$0xff]  }
 0x106   :  { %4788 = vmatpush3.bf16.msra.mxu1 %v5162_v17  ;;  %v4475_v27 = vadd.f32 %v4474_v25, %v4473_v21  ;;  %v4496_v29 = vpop.f32.mrf.mxu1  ;;  %v5200_v21 = vld [vmem:[%s6449_s1 + $0x9e8] sm:$0xff]  }
 0x107   :  { %v4476_v30 = vpop.f32.mrf.mxu0  ;;  %4789 = vmatprep.subr.bf16.mxu1 %v5164_v20  ;;  %v4497_v33 = vadd.f32 %v4496_v29, %v4495_v24  ;;  %v5201_v24 = vld [vmem:[%s6449_s1 + $0x928] sm:$0xff]  }
 0x108   :  { %v3279_v32 = vadd.f32 %v4475_v27, %v6070_v56  ;;  %4768 = vmatpush3.bf16.msra.mxu0 %v5165_v22  ;;  %v4498_v35 = vpop.f32.mrf.mxu1  ;;  %v942_v56 = vrot.slane %v20_v54, %v5405_v41  ;;  %v5202_v27 = vld [vmem:[%s6449_s1 + $0x9a8] sm:$0xff]   ;;  %v5203_v30 = vld [vmem:[%s6449_s1 + $0x960] sm:$0xff]   ;;  %v5224_v54 = vld [vmem:[%s6449_s1 + $0xa78] sm:$0xff]  }
 0x109   :  { %v4477_v36 = vpop.f32.mrf.mxu0  ;;  %4769 = vmatprep.subr.bf16.mxu0 %v5167_v26  ;;  %v5206_v35 = vld [vmem:[%s6449_s1 + $0x9a0] sm:$0xff]  }
 0x10a   :  { %v6171_v38 = vadd.f32 %v4497_v33, %v3279_v32  ;;  %4790 = vmatpush3.bf16.msra.mxu1 %v5166_v23  ;;  %v4499_v40 = vpop.f32.mrf.mxu1  ;;  %v950_v60 = vcombine.high %v942_v56, %v942_v56  ;;  %v958_v4 = vrot.slane %v942_v56, %v5405_v41  ;;  %v5204_v32 = vld [vmem:[%s6449_s1 + $0x9e0] sm:$0xff]   ;;  %v5207_v36 = vld [vmem:[%s6449_s1 + $0x958] sm:$0xff]  }
 0x10b   :  { %4791 = vmatprep.subr.bf16.mxu1 %v5168_v28  ;;  %v5211_v40 = vld [vmem:[%s6449_s1 + $0x950] sm:$0xff]   ;;  %v5226_v56 = vld [vmem:[%s6449_s1 + $0xa38] sm:$0xff]  }
 0x10c   :  { %4770 = vmatpush3.bf16.msra.mxu0 %v5169_v31  ;;  %v972_v0 = vrot.slane %v950_v60, %v5405_v41  ;;  %v980_v10 = vcombine.high %v958_v4, %v958_v4  ;;  %v5229_v60 = vld [vmem:[%s6449_s1 + $0xaf0] sm:$0xff]  }
 0x10d   :  { %4771 = vmatprep.subr.bf16.mxu0 %v5171_v37  ;;  %v5208_v37 = vld [vmem:[%s6449_s1 + $0x9d8] sm:$0xff]  }
 0x10e   :  { %4792 = vmatpush3.bf16.msra.mxu1 %v5170_v34  ;;  %3836 = vmatprep.mubr.bf16.mxu0 %v972_v0  ;;  %v982_v3 = vcombine.high %v972_v0, %v972_v0  ;;  %v5205_v34 = vld [vmem:[%s6449_s1 + $0x920] sm:$0xff]  }
 0x10f   :  { %4793 = vmatprep.subr.bf16.mxu1 %v5172_v39  ;;  %v5210_v39 = vld [vmem:[%s6449_s1 + $0x998] sm:$0xff]  }
 0x110   :  { %4772 = vmatpush3.bf16.msra.mxu0 %v5173_v42  ;;  %3876 = vmatprep.mubr.bf16.mxu1 %v982_v3  ;;  %v5212_v42 = vld [vmem:[%s6449_s1 + $0x9d0] sm:$0xff]  }
 0x111   :  { %4773 = vmatprep.subr.bf16.mxu0 %v5175_v44  ;;  %v5214_v44 = vld [vmem:[%s6449_s1 + $0x990] sm:$0xff]  }
 0x112   :  { %4794 = vmatpush3.bf16.msra.mxu1 %v5174_v43  ;;  %v5213_v43 = vld [vmem:[%s6449_s1 + $0x910] sm:$0xff]  }
 0x113   :  { %4795 = vmatprep.subr.bf16.mxu1 %v5176_v45  ;;  %v5215_v45 = vld [vmem:[%s6449_s1 + $0x948] sm:$0xff]  }
 0x114   :  { %4774 = vmatpush3.bf16.msra.mxu0 %v5177_v46  ;;  %v5216_v46 = vld [vmem:[%s6449_s1 + $0x9c8] sm:$0xff]  }
 0x115   :  { %4775 = vmatprep.subr.bf16.mxu0 %v5179_v48  ;;  %v5218_v48 = vld [vmem:[%s6449_s1 + $0x988] sm:$0xff]  }
 0x116   :  { %4796 = vmatpush3.bf16.msra.mxu1 %v5178_v47  ;;  %v5217_v47 = vld [vmem:[%s6449_s1 + $0x908] sm:$0xff]  }
 0x117   :  { %4797 = vmatprep.subr.bf16.mxu1 %v5180_v49  ;;  %v5219_v49 = vld [vmem:[%s6449_s1 + $0x940] sm:$0xff]  }
 0x118   :  { %4776 = vmatpush3.bf16.msra.mxu0 %v5181_v50  ;;  %v5220_v50 = vld [vmem:[%s6449_s1 + $0x9c0] sm:$0xff]  }
 0x119   :  { %4777 = vmatprep.subr.bf16.mxu0 %v5183_v52  ;;  %v5222_v52 = vld [vmem:[%s6449_s1 + $0x980] sm:$0xff]  }
 0x11a   :  { %4798 = vmatpush3.bf16.msra.mxu1 %v5182_v51  ;;  %v5221_v51 = vld [vmem:[%s6449_s1 + $0x900] sm:$0xff]  }
 0x11b   :  { %4799 = vmatprep.subr.bf16.mxu1 %v5184_v53  ;;  %v965_v53 = vrot.slane %v6226_v61, %v5405_v41 }
 0x11c   :  { %4778 = vmatpush3.bf16.msra.mxu0 %v5185_v55  ;;  %v5225_v55 = vld [vmem:[%s6449_s1 + $0xaf8] sm:$0xff]  }
 0x11d   :  { %4779 = vmatprep.subr.bf16.mxu0 %v5187_v59  ;;  %v5228_v59 = vld [vmem:[%s6449_s1 + $0xa70] sm:$0xff]  }
 0x11e   :  { %4800 = vmatpush3.bf16.msra.mxu1 %v5186_v58  ;;  %v981_v58 = vcombine.high %v965_v53, %v965_v53 }
 0x11f   :  { %4801 = vmatprep.subr.bf16.mxu1 %v5188_v62  ;;  %v5230_v62 = vld [vmem:[%s6449_s1 + $0xa30] sm:$0xff]  }
 0x120   :  { %4780 = vmatpush3.bf16.msra.mxu0 %v5189_v63  ;;  %v5231_v63 = vld [vmem:[%s6449_s1 + $0xab0] sm:$0xff]  }
 0x121   :  { %4809 = vmatprep.subr.bf16.mxu0 %v5191_v5 }
 0x122   :  { %4802 = vmatpush3.bf16.msra.mxu1 %v5190_v2  ;;  %v5232_v2 = vld [vmem:[%s6449_s1 + $0xa68] sm:$0xff]  }
 0x123   :  { %v4517_v14 = vpop.f32.mrf.mxu0  ;;  %3837 = vmatmul.mubr.bf16.vlgmr.msra.gmra.mxu0 %v958_v4  ;;  %4831 = vmatprep.subr.bf16.mxu1 %v5192_v6  ;;  %v5233_v4 = vld [vmem:[%s6449_s1 + $0xae8] sm:$0xff]  }
 0x124   :  { %4810 = vmatpush3.bf16.msra.mxu0 %v5193_v8  ;;  %3916 = vmatprep.mubr.bf16.mxu0 %v979_v7  ;;  %v5234_v7 = vld [vmem:[%s6449_s1 + $0xa28] sm:$0xff]  }
 0x125   :  { %v4539_v17 = vpop.f32.mrf.mxu1  ;;  %3877 = vmatmul.mubr.bf16.vlgmr.msra.gmra.mxu1 %v980_v10  ;;  %v4518_v18 = vpop.f32.mrf.mxu0  ;;  %4811 = vmatprep.subr.bf16.mxu0 %v5195_v11  ;;  %v5235_v10 = vld [vmem:[%s6449_s1 + $0xaa8] sm:$0xff]  }
 0x126   :  { %4832 = vmatpush3.bf16.msra.mxu1 %v5194_v9  ;;  %v4519_v20 = vadd.f32 %v4518_v18, %v4517_v14  ;;  %3956 = vmatprep.mubr.bf16.mxu1 %v983_v13  ;;  %v5236_v13 = vld [vmem:[%s6449_s1 + $0xa60] sm:$0xff]  }
 0x127   :  { %v4540_v22 = vpop.f32.mrf.mxu1  ;;  %v4520_v23 = vpop.f32.mrf.mxu0  ;;  %4833 = vmatprep.subr.bf16.mxu1 %v5196_v12  ;;  %v5239_v18 = vld [vmem:[%s6449_s1 + $0xaa0] sm:$0xff]  }
 0x128   :  { %v3359_v25 = vadd.f32 %v4519_v20, %v6171_v38  ;;  %v4541_v26 = vadd.f32 %v4540_v22, %v4539_v17  ;;  %4812 = vmatpush3.bf16.msra.mxu0 %v5197_v15  ;;  %v5209_v38 = vld [vmem:[%s6449_s1 + $0x918] sm:$0xff]   ;;  %v5237_v15 = vld [vmem:[%s6449_s1 + $0xae0] sm:$0xff]   ;;  %v5244_v23 = vld [vmem:[%s6449_s1 + $0xa50] sm:$0xff]  }
 0x129   :  { %v4542_v28 = vpop.f32.mrf.mxu1  ;;  %v4521_v29 = vpop.f32.mrf.mxu0  ;;  %4813 = vmatprep.subr.bf16.mxu0 %v5199_v19  ;;  %v5238_v17 = vld [vmem:[%s6449_s1 + $0xa20] sm:$0xff]   ;;  %v5240_v19 = vld [vmem:[%s6449_s1 + $0xa58] sm:$0xff]  }
 0x12a   :  { %v6282_v31 = vadd.f32 %v4541_v26, %v3359_v25  ;;  %4834 = vmatpush3.bf16.msra.mxu1 %v5198_v16  ;;  %v5241_v20 = vld [vmem:[%s6449_s1 + $0xad8] sm:$0xff]   ;;  %v5246_v25 = vld [vmem:[%s6449_s1 + $0xa10] sm:$0xff]   ;;  %v5249_v28 = vld [vmem:[%s6449_s1 + $0xac8] sm:$0xff]  }
 0x12b   :  { %v4543_v33 = vpop.f32.mrf.mxu1  ;;  %4835 = vmatprep.subr.bf16.mxu1 %v5200_v21  ;;  %v5242_v21 = vld [vmem:[%s6449_s1 + $0xa18] sm:$0xff]   ;;  %v5247_v26 = vld [vmem:[%s6449_s1 + $0xa90] sm:$0xff]   ;;  %v4060_v29 = vld.sshfl [vmem:[%s6448_s0 + $0x28] sm:$0x33 pattern:$0x75316420] }
 0x12c   :  { %4814 = vmatpush3.bf16.msra.mxu0 %v5201_v24  ;;  %v5243_v22 = vld [vmem:[%s6449_s1 + $0xa98] sm:$0xff]   ;;  %v5245_v24 = vld [vmem:[%s6449_s1 + $0xad0] sm:$0xff]  }
 0x12d   :  { %4815 = vmatprep.subr.bf16.mxu0 %v5203_v30 }
 0x12e   :  { %4836 = vmatpush3.bf16.msra.mxu1 %v5202_v27  ;;  %v5248_v27 = vld [vmem:[%s6449_s1 + $0xa48] sm:$0xff]  }
 0x12f   :  { %4837 = vmatprep.subr.bf16.mxu1 %v5204_v32 }
 0x130   :  { %4816 = vmatpush3.bf16.msra.mxu0 %v5205_v34 }
 0x131   :  { %4817 = vmatprep.subr.bf16.mxu0 %v5207_v36 }
 0x132   :  { %4838 = vmatpush3.bf16.msra.mxu1 %v5206_v35 }
 0x133   :  { %4839 = vmatprep.subr.bf16.mxu1 %v5208_v37 }
 0x134   :  { %4818 = vmatpush3.bf16.msra.mxu0 %v5209_v38 }
 0x135   :  { %4819 = vmatprep.subr.bf16.mxu0 %v5211_v40 }
 0x136   :  { %4840 = vmatpush3.bf16.msra.mxu1 %v5210_v39 }
 0x137   :  { %4841 = vmatprep.subr.bf16.mxu1 %v5212_v42 }
 0x138   :  { %4820 = vmatpush3.bf16.msra.mxu0 %v5213_v43 }
 0x139   :  { %4821 = vmatprep.subr.bf16.mxu0 %v5215_v45 }
 0x13a   :  { %4842 = vmatpush3.bf16.msra.mxu1 %v5214_v44 }
 0x13b   :  { %4843 = vmatprep.subr.bf16.mxu1 %v5216_v46 }
 0x13c   :  { %4822 = vmatpush3.bf16.msra.mxu0 %v5217_v47 }
 0x13d   :  { %4823 = vmatprep.subr.bf16.mxu0 %v5219_v49 }
 0x13e   :  { %4844 = vmatpush3.bf16.msra.mxu1 %v5218_v48 }
 0x13f   :  { %4845 = vmatprep.subr.bf16.mxu1 %v5220_v50 }
 0x140   :  { %4824 = vmatpush3.bf16.msra.mxu0 %v5221_v51 }
 0x141   :  { %4853 = vmatprep.subr.bf16.mxu0 %v5224_v54 }
 0x142   :  { %4846 = vmatpush3.bf16.msra.mxu1 %v5222_v52 }
 0x143   :  { %v4561_v61 = vpop.f32.mrf.mxu0  ;;  %3917 = vmatmul.mubr.bf16.vlgmr.msra.gmra.mxu0 %v965_v53  ;;  %4875 = vmatprep.subr.bf16.mxu1 %v5225_v55 }
 0x144   :  { %4854 = vmatpush3.bf16.msra.mxu0 %v5226_v56 }
 0x145   :  { %v4583_v0 = vpop.f32.mrf.mxu1  ;;  %3957 = vmatmul.mubr.bf16.vlgmr.msra.gmra.mxu1 %v981_v58  ;;  %v4562_v1 = vpop.f32.mrf.mxu0  ;;  %4855 = vmatprep.subr.bf16.mxu0 %v5228_v59 }
 0x146   :  { %4876 = vmatpush3.bf16.msra.mxu1 %v5227_v57  ;;  %v4563_v3 = vadd.f32 %v4562_v1, %v4561_v61 }
 0x147   :  { %v4584_v5 = vpop.f32.mrf.mxu1  ;;  %v4564_v6 = vpop.f32.mrf.mxu0  ;;  %4877 = vmatprep.subr.bf16.mxu1 %v5229_v60 }
 0x148   :  { %v3439_v8 = vadd.f32 %v4563_v3, %v6282_v31  ;;  %v4585_v9 = vadd.f32 %v4584_v5, %v4583_v0  ;;  %4856 = vmatpush3.bf16.msra.mxu0 %v5230_v62 }
 0x149   :  { %v4586_v11 = vpop.f32.mrf.mxu1  ;;  %v4565_v12 = vpop.f32.mrf.mxu0  ;;  %4857 = vmatprep.subr.bf16.mxu0 %v5232_v2 }
 0x14a   :  { %v3479_v14 = vadd.f32 %v4585_v9, %v3439_v8  ;;  %4878 = vmatpush3.bf16.msra.mxu1 %v5231_v63 }
 0x14b   :  { %v4587_v16 = vpop.f32.mrf.mxu1  ;;  %4879 = vmatprep.subr.bf16.mxu1 %v5233_v4 }
 0x14c   :  { %4858 = vmatpush3.bf16.msra.mxu0 %v5234_v7 }
 0x14d   :  { %4859 = vmatprep.subr.bf16.mxu0 %v5236_v13 }
 0x14e   :  { %4880 = vmatpush3.bf16.msra.mxu1 %v5235_v10 }
 0x14f   :  { %4881 = vmatprep.subr.bf16.mxu1 %v5237_v15 }
 0x150   :  { %4860 = vmatpush3.bf16.msra.mxu0 %v5238_v17 }
 0x151   :  { %4861 = vmatprep.subr.bf16.mxu0 %v5240_v19 }
 0x152   :  { %4882 = vmatpush3.bf16.msra.mxu1 %v5239_v18 }
 0x153   :  { %4883 = vmatprep.subr.bf16.mxu1 %v5241_v20 }
 0x154   :  { %4862 = vmatpush3.bf16.msra.mxu0 %v5242_v21 }
 0x155   :  { %4863 = vmatprep.subr.bf16.mxu0 %v5244_v23 }
 0x156   :  { %4884 = vmatpush3.bf16.msra.mxu1 %v5243_v22 }
 0x157   :  { %4885 = vmatprep.subr.bf16.mxu1 %v5245_v24 }
 0x158   :  { %8 = vsyncpa [#allocation3], 0  ;;  %4864 = vmatpush3.bf16.msra.mxu0 %v5246_v25  ;;  %v5250_v30 = vld [vmem:[%s6449_s1 + $0xa08] sm:$0xff]   ;;  %v991_v31 = vcombine.high %v4060_v29, %v4060_v29  ;;  %v5252_v32 = vld [vmem:[%s6449_s1 + $0xa40] sm:$0xff]   ;;  %v998_v38 = vrot.slane %v4060_v29, %v5405_v41 }
 0x159   :  { %4865 = vmatprep.subr.bf16.mxu0 %v5248_v27  ;;  %v5251_v33 = vld [vmem:[%s6449_s1 + $0xa88] sm:$0xff]   ;;  %v5253_v35 = vld [vmem:[%s6449_s1 + $0xac0] sm:$0xff]  }
 0x15a   :  { %4886 = vmatpush3.bf16.msra.mxu1 %v5247_v26  ;;  %v1005_v34 = vrot.slane %v991_v31, %v5405_v41  ;;  %v5254_v36 = vld [vmem:[%s6449_s1 + $0xa00] sm:$0xff]   ;;  %v1006_v40 = vcombine.high %v998_v38, %v998_v38 }
 0x15b   :  { %4887 = vmatprep.subr.bf16.mxu1 %v5249_v28  ;;  %v5255_v39 = vld [vmem:[%s6449_s1 + $0xa80] sm:$0xff]   ;;  %s5279_s1 = smov [#allocation2]  }
 0x15c   :  { %4866 = vmatpush3.bf16.msra.mxu0 %v5250_v30  ;;  %3996 = vmatprep.mubr.bf16.mxu0 %v1005_v34  ;;  %v1007_v37 = vcombine.high %v1005_v34, %v1005_v34  ;;  %s4051_s18 = sshll.u32 %s5279_s1, 4  ;;  %s4052_s18 = int_to_ptr.vmem [resolvable:$true] %s4051_s18 }
 0x15d   :  { %4867 = vmatprep.subr.bf16.mxu0 %v5252_v32  ;;  %s5256_s19 = scalar_lea.vmem %s4052_s18, 32  ;;  %p5261_p1 = scmp.lt.s32.totalorder %s4052_s18, %s4052_s18 }
 0x15e   :  { %4888 = vmatpush3.bf16.msra.mxu1 %v5251_v33  ;;  %4036 = vmatprep.mubr.bf16.mxu1 %v1007_v37  ;;  %p5257_p0 = scmp.ne.s32.totalorder %s4052_s18, %s5256_s19  ;;  %p5262_p2 = scmp.lt.s32.totalorder %s5256_s19, %s5256_s19 }
 0x15f   :  { %4889 = vmatprep.subr.bf16.mxu1 %v5253_v35 }
 0x160   :  { %4868 = vmatpush3.bf16.msra.mxu0 %v5254_v36  ;;  %p5263_p3 = por %p5262_p2, %p5261_p1 }
 0x162   :  { %4890 = vmatpush3.bf16.msra.mxu1 %v5255_v39  ;;  %p5264_p4 = pnand %p5263_p3, %p5257_p0 }
 0x163   :  { %v4605_v42 = vpop.f32.mrf.mxu0  ;;  %3997 = vmatmul.mubr.bf16.vlgmr.msra.gmra.mxu0 %v998_v38 }
 0x165   :  { %v4627_v43 = vpop.f32.mrf.mxu1  ;;  %4037 = vmatmul.mubr.bf16.vlgmr.msra.gmra.mxu1 %v1006_v40  ;;  %v4606_v44 = vpop.f32.mrf.mxu0 }
 0x166   :  { %v4607_v45 = vadd.f32 %v4606_v44, %v4605_v42 }
 0x167   :  { %v4628_v46 = vpop.f32.mrf.mxu1  ;;  %v4608_v47 = vpop.f32.mrf.mxu0 }
 0x168   :  { %v3519_v48 = vadd.f32 %v4607_v45, %v3479_v14  ;;  %v4629_v41 = vadd.f32 %v4628_v46, %v4627_v43 }
 0x169   :  { %v4630_v49 = vpop.f32.mrf.mxu1  ;;  %v4609_v50 = vpop.f32.mrf.mxu0 }
 0x16a   :  { %v3559_v51 = vadd.f32 %v4629_v41, %v3519_v48 }
 0x16b   :  { %v4631_v52 = vpop.f32.mrf.mxu1 }
 0x183   :  { %v4649_v53 = vpop.f32.mrf.mxu0 }
 0x185   :  { %v4671_v54 = vpop.f32.mrf.mxu1  ;;  %v4650_v55 = vpop.f32.mrf.mxu0 }
 0x186   :  { %v4651_v56 = vadd.f32 %v4650_v55, %v4649_v53 }
 0x187   :  { %v4672_v57 = vpop.f32.mrf.mxu1  ;;  %v4652_v58 = vpop.f32.mrf.mxu0 }
 0x188   :  { %v3599_v59 = vadd.f32 %v4651_v56, %v3559_v51  ;;  %v4673_v60 = vadd.f32 %v4672_v57, %v4671_v54 }
 0x189   :  { %v4674_v61 = vpop.f32.mrf.mxu1  ;;  %v4653_v62 = vpop.f32.mrf.mxu0 }
 0x18a   :  { %v3639_v63 = vadd.f32 %v4673_v60, %v3599_v59 }
 0x18b   :  { %v4675_v0 = vpop.f32.mrf.mxu1 }
 0x1a3   :  { %v4693_v1 = vpop.f32.mrf.mxu0 }
 0x1a5   :  { %v4715_v2 = vpop.f32.mrf.mxu1  ;;  %v4694_v3 = vpop.f32.mrf.mxu0 }
 0x1a6   :  { %v4695_v4 = vadd.f32 %v4694_v3, %v4693_v1 }
 0x1a7   :  { %v4716_v5 = vpop.f32.mrf.mxu1  ;;  %v4696_v6 = vpop.f32.mrf.mxu0 }
 0x1a8   :  { %v3679_v7 = vadd.f32 %v4695_v4, %v3639_v63  ;;  %v4717_v8 = vadd.f32 %v4716_v5, %v4715_v2 }
 0x1a9   :  { %v4718_v9 = vpop.f32.mrf.mxu1  ;;  %v4697_v10 = vpop.f32.mrf.mxu0 }
 0x1aa   :  { %v3719_v11 = vadd.f32 %v4717_v8, %v3679_v7 }
 0x1ab   :  { %v4719_v12 = vpop.f32.mrf.mxu1 }
 0x1c3   :  { %v4737_v13 = vpop.f32.mrf.mxu0 }
 0x1c5   :  { %v4759_v14 = vpop.f32.mrf.mxu1  ;;  %v4738_v15 = vpop.f32.mrf.mxu0 }
 0x1c6   :  { %v4739_v16 = vadd.f32 %v4738_v15, %v4737_v13 }
 0x1c7   :  { %v4760_v17 = vpop.f32.mrf.mxu1  ;;  %v4740_v18 = vpop.f32.mrf.mxu0 }
 0x1c8   :  { %v3759_v19 = vadd.f32 %v4739_v16, %v3719_v11  ;;  %v4761_v20 = vadd.f32 %v4760_v17, %v4759_v14 }
 0x1c9   :  { %v4762_v21 = vpop.f32.mrf.mxu1  ;;  %v4741_v22 = vpop.f32.mrf.mxu0 }
 0x1ca   :  { %v3799_v23 = vadd.f32 %v4761_v20, %v3759_v19 }
 0x1cb   :  { %v4763_v24 = vpop.f32.mrf.mxu1 }
 0x1e3   :  { %v4781_v25 = vpop.f32.mrf.mxu0 }
 0x1e5   :  { %v4803_v26 = vpop.f32.mrf.mxu1  ;;  %v4782_v27 = vpop.f32.mrf.mxu0 }
 0x1e6   :  { %v4783_v42 = vadd.f32 %v4782_v27, %v4781_v25 }
 0x1e7   :  { %v4804_v28 = vpop.f32.mrf.mxu1  ;;  %v4784_v29 = vpop.f32.mrf.mxu0 }
 0x1e8   :  { %v3839_v43 = vadd.f32 %v4783_v42, %v3799_v23  ;;  %v4805_v44 = vadd.f32 %v4804_v28, %v4803_v26 }
 0x1e9   :  { %v4806_v30 = vpop.f32.mrf.mxu1  ;;  %v4785_v31 = vpop.f32.mrf.mxu0 }
 0x1ea   :  { %v3879_v46 = vadd.f32 %v4805_v44, %v3839_v43 }
 0x1eb   :  { %v4807_v32 = vpop.f32.mrf.mxu1 }
 0x203   :  { %v4825_v33 = vpop.f32.mrf.mxu0 }
 0x205   :  { %v4847_v34 = vpop.f32.mrf.mxu1  ;;  %v4826_v35 = vpop.f32.mrf.mxu0 }
 0x206   :  { %v4827_v45 = vadd.f32 %v4826_v35, %v4825_v33 }
 0x207   :  { %v4848_v36 = vpop.f32.mrf.mxu1  ;;  %v4828_v37 = vpop.f32.mrf.mxu0 }
 0x208   :  { %v3919_v47 = vadd.f32 %v4827_v45, %v3879_v46  ;;  %v4849_v48 = vadd.f32 %v4848_v36, %v4847_v34 }
 0x209   :  { %v4850_v38 = vpop.f32.mrf.mxu1  ;;  %v4829_v39 = vpop.f32.mrf.mxu0 }
 0x20a   :  { %v3959_v51 = vadd.f32 %v4849_v48, %v3919_v47 }
 0x20b   :  { %v4851_v40 = vpop.f32.mrf.mxu1 }
 0x223   :  { %v4869_v41 = vpop.f32.mrf.mxu0 }
 0x225   :  { %v4891_v49 = vpop.f32.mrf.mxu1  ;;  %v4870_v50 = vpop.f32.mrf.mxu0 }
 0x226   :  { %v4871_v52 = vadd.f32 %v4870_v50, %v4869_v41 }
 0x227   :  { %v4892_v53 = vpop.f32.mrf.mxu1  ;;  %v4872_v54 = vpop.f32.mrf.mxu0 }
 0x228   :  { %v3999_v55 = vadd.f32 %v4871_v52, %v3959_v51  ;;  %v4893_v56 = vadd.f32 %v4892_v53, %v4891_v49 }
 0x229   :  { %v4894_v57 = vpop.f32.mrf.mxu1  ;;  %v4873_v58 = vpop.f32.mrf.mxu0 }
 0x22a   :  { %v4039_v59 = vadd.f32 %v4893_v56, %v3999_v55 }
 0x22b   :  { %v4895_v60 = vpop.f32.mrf.mxu1 }
 0x22c   :  { %4044 = vst [vmem:[#allocation2] sm:$0x3] %v4039_v59 }
 0x22d   :  { %5267 = shalt.err (!%p5264_p4)
}
 0x22e   :  { %4054 = dma.vmem_to_hbm [thread:$0]  %s4052_s18, 32, %s6451_s3, [#allocation3]  }
 0x22f   :  { %5276 = dma.done.wait [#allocation3], 32  }
 0x230   :  { %5277 = vsyncadd [#allocation3], 4294967264 }
 0x231   :  { %4058 = vsyncpa [#allocation3], 1 }

</bundles_post_ra>
